<compile_context>
chip_gen: v5e
topology: v5e:2x2
jax: 0.10.0
libtpu: 0.0.40
codegen_flags: <defaults>
</compile_context>

<pallas_src>
import functools

import jax
import jax.numpy as jnp
from jax import lax
from jax.experimental import pallas as pl
from jax.experimental.pallas import tpu as pltpu

XI = 1e-6
EPS = 8.0
ITER_NUM = 1

_NEG = -1e9        # logit value for padded class lanes -> exactly 0 softmax prob, no inf/NaN
_LANE = 128
_SUBLANE = 8


def _round_up(n, m):
    return ((n + m - 1) // m) * m


def _vmem_spec():
    # Whole array resident in VMEM; no grid / pipelining needed at this size.
    return pl.BlockSpec(memory_space=pltpu.MemorySpace.VMEM)


def _softmax_and_logsoftmax(z):
    # One shared max/exp/sum pass for both softmax and log_softmax.
    m = jnp.max(z, axis=-1, keepdims=True)
    zm = z - m
    e = jnp.exp(zm)
    s = jnp.sum(e, axis=-1, keepdims=True)
    # Exact divide for the probabilities (see module docstring re: p - q).
    return e / s, zm - jnp.log(s)


def _norm_vector(v):
    # v = v / (1e-12 + max_CHW |v|) ; v = v / sqrt(1e-6 + sum_CHW v^2)
    # Divides replaced by EUP approx-reciprocal / rsqrt multiplies.
    s1 = pl.reciprocal(1e-12 + jnp.max(jnp.abs(v), axis=-1, keepdims=True),
                       approx=True)
    v = v * s1
    s2 = lax.rsqrt(1e-6 + jnp.sum(v * v, axis=-1, keepdims=True))
    return v * s2


# ----------------------------- fused Pallas kernel -----------------------------

def _vat_fused_kernel(xd_ref, w_ref, wt_ref, b_ref, o_ref, *,
                      xi, eps, iter_num, batch, bp):
    f32 = jnp.float32

    # Stacked input [x ; d0] (rows 0..bp-1 = padded x, rows bp..2bp-1 = padded d0).
    xd = xd_ref[...]                                              # (2*Bp, Dp)

    # norm_vector applied only to the d0 rows via a row-wise masked scale
    # (x rows get scale 1.0) -- avoids any in-kernel concat/relayout.
    is_d_row = lax.broadcasted_iota(jnp.int32, (2 * bp, 1), 0) >= bp
    s1 = pl.reciprocal(1e-12 + jnp.max(jnp.abs(xd), axis=-1, keepdims=True),
                       approx=True)
    v1 = xd * s1
    s2 = lax.rsqrt(1e-6 + jnp.sum(v1 * v1, axis=-1, keepdims=True))
    stacked = xd * jnp.where(is_d_row, s1 * s2, 1.0)              # (2*Bp, Dp)

    # ONE matmul streams W through the MXU once for both the clean forward
    # and norm(d0) @ W.
    prod = jnp.dot(stacked, w_ref[...], preferred_element_type=f32)   # (2Bp, Kp)
    logits = prod[:bp] + b_ref[...]        # model(x); padded class lanes ~ -1e9
    d_w = prod[bp:]                        # norm(d0) @ W  (bias excluded)

    q, logq = _softmax_and_logsoftmax(logits)   # softmax(logits), log_softmax(logits)

    # Power iteration.  For the linear model, autograd's gradient of
    # kl_div(logits, model(x + xi*d)) w.r.t. d is
    #   (xi/B) * (softmax(logits + xi*(d@W)) - softmax(logits)) @ W^T ;
    # the positive xi/B factor is dropped (norm_vector is scale-invariant).
    # TODO(synk): disable_tracking_bn_stats has no effect here (no BatchNorm in
    # the synthetic linear model).
    d = stacked[bp:, :]                    # norm_vector(d0); used if iter_num == 0
    for it in range(iter_num):
        p, _ = _softmax_and_logsoftmax(logits + xi * d_w)
        g = p - q                                                  # (Bp, Kp)
        grad_d = jnp.dot(g, wt_ref[...], preferred_element_type=f32)   # (Bp, Dp)
        d = _norm_vector(grad_d)
        if it + 1 < iter_num:
            d_w = jnp.dot(d, w_ref[...], preferred_element_type=f32)

    # r_adv = eps * d ; lds = kl_div(model(x + r_adv), logits)
    pred_fin = logits + eps * jnp.dot(d, w_ref[...], preferred_element_type=f32)
    qa, a_ls = _softmax_and_logsoftmax(pred_fin)
    per_row = jnp.sum(qa * (a_ls - logq), axis=-1, keepdims=True)  # (Bp, 1)
    row_mask = lax.broadcasted_iota(jnp.int32, per_row.shape, 0) < batch
    per_row = jnp.where(row_mask, per_row, 0.0)                    # drop pad rows
    o_ref[...] = jnp.sum(per_row, axis=0, keepdims=True) * (1.0 / batch)   # (1, 1)


# ------------------------------- host wrappers -------------------------------

def prepare_vat_params(W, b2):
    """Pad the static classifier parameters ONCE (outside the per-call path)."""
    D, K = W.shape
    Dp = _round_up(D, _LANE)
    Kp = max(_LANE, _round_up(K, _LANE))
    Wf = W.astype(jnp.float32)
    w_pad = jnp.zeros((Dp, Kp), jnp.float32).at[:D, :K].set(Wf)
    wt_pad = jnp.zeros((Kp, Dp), jnp.float32).at[:K, :D].set(Wf.T)
    b_pad = jnp.full((1, Kp), _NEG, jnp.float32).at[:, :K].set(
        b2.reshape(1, K).astype(jnp.float32))
    return w_pad, wt_pad, b_pad


@functools.partial(jax.jit, static_argnames=("xi", "eps", "iter_num"))
def vat_loss(x, w_pad, wt_pad, b_pad, noise_key, xi=XI, eps=EPS, iter_num=ITER_NUM):
    B = x.shape[0]
    D = 1
    for s in x.shape[1:]:
        D *= s
    Dp, Kp = w_pad.shape
    Bp = max(_SUBLANE, _round_up(B, _SUBLANE))

    x_flat = x.reshape(B, D).astype(jnp.float32)

    # d = randn_like(x): kept host-side so the N(0,1) draw stays an explicit
    # keyed jax.random draw (in-kernel pltpu PRNG would save one ~8 KiB HBM
    # round trip but changes the noise stream).
    d0 = jax.random.normal(noise_key, (B, D), dtype=jnp.float32)

    # Only per-call host-side build: the tiny (2*Bp, Dp) stacked [x ; d0]
    # operand (64 KiB here).  The large W / W^T / b pads were done once in
    # prepare_vat_params.
    xd = jnp.zeros((2 * Bp, Dp), jnp.float32)
    xd = xd.at[:B, :D].set(x_flat)
    xd = xd.at[Bp:Bp + B, :D].set(d0)

    kernel = functools.partial(
        _vat_fused_kernel,
        xi=float(xi), eps=float(eps), iter_num=int(iter_num),
        batch=int(B), bp=int(Bp))

    lds = pl.pallas_call(
        kernel,
        out_shape=jax.ShapeDtypeStruct((1, 1), jnp.float32),
        in_specs=[_vmem_spec(), _vmem_spec(), _vmem_spec(), _vmem_spec()],
        out_specs=_vmem_spec(),
    )(xd, w_pad, wt_pad, b_pad)
    return lds[0, 0]


if __name__ == "__main__":
    key = jax.random.PRNGKey(0)
    kx, kd, kw = jax.random.split(key, 3)

    B, C, H, Wd = 2, 4, 16, 16
    K = 10
    D = C * H * Wd

    x = jax.random.normal(kx, (B, C, H, Wd), dtype=jnp.float32)
    # Deterministic synthetic linear classifier parameters.
    W = jax.random.normal(kw, (D, K), dtype=jnp.float32) * 0.02
    b2 = jnp.zeros((1, K), dtype=jnp.float32)

    w_pad, wt_pad, b_pad = prepare_vat_params(W, b2)   # one-time padding

    lds = vat_loss(x, w_pad, wt_pad, b_pad, kd)
    jax.block_until_ready(lds)
    print("KERNEL_OK")
</pallas_src>

<mosaic_0001>
module attributes {stable_mosaic.version = 11 : i64} {
  func.func @_vat_fused_kernel(%arg0: memref<16x1024xf32, #tpu.memory_space<vmem>>, %arg1: memref<1024x128xf32, #tpu.memory_space<vmem>>, %arg2: memref<128x1024xf32, #tpu.memory_space<vmem>>, %arg3: memref<1x128xf32, #tpu.memory_space<vmem>>, %arg4: memref<1x1xf32, #tpu.memory_space<vmem>>) attributes {dimension_semantics = [], scalar_prefetch = 0 : i64, scratch_operands = 0 : i64, tpu.core_type = #tpu.core_type<tc>} {
    %c0 = arith.constant 0 : index
    %c0_0 = arith.constant 0 : index
    %0 = vector.load %arg0[%c0, %c0_0] : memref<16x1024xf32, #tpu.memory_space<vmem>>, vector<16x1024xf32>
    %1 = tpu.iota {dimensions = array<i32: 0>} : vector<16x1xi32>
    %c8_i32 = arith.constant 8 : i32
    %2 = vector.broadcast %c8_i32 : i32 to vector<16x1xi32>
    %3 = arith.cmpi sge, %1, %2 : vector<16x1xi32>
    %4 = math.absf %0 : vector<16x1024xf32>
    %cst = arith.constant dense<0xFF800000> : vector<16xf32>
    %5 = vector.multi_reduction <maximumf>, %4, %cst [1] : vector<16x1024xf32> to vector<16xf32>
    %6 = vector.shape_cast %5 : vector<16xf32> to vector<16x1xf32>
    %cst_1 = arith.constant 9.99999996E-13 : f32
    %7 = vector.broadcast %cst_1 : f32 to vector<16x1xf32>
    %8 = arith.addf %7, %6 : vector<16x1xf32>
    %9 = tpu.reciprocal %8 {approx = true} : vector<16x1xf32> -> vector<16x1xf32>
    %10 = vector.broadcast %9 : vector<16x1xf32> to vector<16x1024xf32>
    %11 = arith.mulf %0, %10 : vector<16x1024xf32>
    %12 = arith.mulf %11, %11 : vector<16x1024xf32>
    %cst_2 = arith.constant dense<0.000000e+00> : vector<16xf32>
    %13 = vector.multi_reduction <add>, %12, %cst_2 [1] : vector<16x1024xf32> to vector<16xf32>
    %14 = vector.shape_cast %13 : vector<16xf32> to vector<16x1xf32>
    %cst_3 = arith.constant 9.99999997E-7 : f32
    %15 = vector.broadcast %cst_3 : f32 to vector<16x1xf32>
    %16 = arith.addf %15, %14 : vector<16x1xf32>
    %17 = math.rsqrt %16 : vector<16x1xf32>
    %18 = arith.mulf %9, %17 : vector<16x1xf32>
    %cst_4 = arith.constant 1.000000e+00 : f32
    %19 = vector.broadcast %cst_4 : f32 to vector<16x1xf32>
    %20 = arith.select %3, %18, %19 : vector<16x1xi1>, vector<16x1xf32>
    %21 = vector.broadcast %20 : vector<16x1xf32> to vector<16x1024xf32>
    %22 = arith.mulf %0, %21 : vector<16x1024xf32>
    %c0_5 = arith.constant 0 : index
    %c0_6 = arith.constant 0 : index
    %23 = vector.load %arg1[%c0_5, %c0_6] : memref<1024x128xf32, #tpu.memory_space<vmem>>, vector<1024x128xf32>
    %cst_7 = arith.constant dense<0.000000e+00> : vector<16x128xf32>
    %24 = tpu.matmul %22, %23, %cst_7 {dimension_numbers = #tpu.dot_dimension_numbers<[1], [0], [0], [1], [0, 0, 1, 1], [], []>} : vector<16x1024xf32>, vector<1024x128xf32>, vector<16x128xf32> -> vector<16x128xf32>
    %25 = vector.extract_strided_slice %24 {offsets = [0, 0], sizes = [8, 128], strides = [1, 1]} : vector<16x128xf32> to vector<8x128xf32>
    %c0_8 = arith.constant 0 : index
    %c0_9 = arith.constant 0 : index
    %26 = vector.load %arg3[%c0_8, %c0_9] : memref<1x128xf32, #tpu.memory_space<vmem>>, vector<1x128xf32>
    %27 = vector.broadcast %26 : vector<1x128xf32> to vector<8x128xf32>
    %28 = arith.addf %25, %27 : vector<8x128xf32>
    %29 = vector.extract_strided_slice %24 {offsets = [8, 0], sizes = [8, 128], strides = [1, 1]} : vector<16x128xf32> to vector<8x128xf32>
    %cst_10 = arith.constant dense<0xFF800000> : vector<8xf32>
    %30 = vector.multi_reduction <maximumf>, %28, %cst_10 [1] : vector<8x128xf32> to vector<8xf32>
    %31 = vector.shape_cast %30 : vector<8xf32> to vector<8x1xf32>
    %32 = vector.broadcast %31 : vector<8x1xf32> to vector<8x128xf32>
    %33 = arith.subf %28, %32 : vector<8x128xf32>
    %34 = math.exp %33 : vector<8x128xf32>
    %cst_11 = arith.constant dense<0.000000e+00> : vector<8xf32>
    %35 = vector.multi_reduction <add>, %34, %cst_11 [1] : vector<8x128xf32> to vector<8xf32>
    %36 = vector.shape_cast %35 : vector<8xf32> to vector<8x1xf32>
    %37 = vector.broadcast %36 : vector<8x1xf32> to vector<8x128xf32>
    %38 = arith.divf %34, %37 : vector<8x128xf32>
    %39 = math.log %36 : vector<8x1xf32>
    %40 = vector.broadcast %39 : vector<8x1xf32> to vector<8x128xf32>
    %41 = arith.subf %33, %40 : vector<8x128xf32>
    %cst_12 = arith.constant 9.99999997E-7 : f32
    %42 = vector.broadcast %cst_12 : f32 to vector<8x128xf32>
    %43 = arith.mulf %42, %29 : vector<8x128xf32>
    %44 = arith.addf %28, %43 : vector<8x128xf32>
    %cst_13 = arith.constant dense<0xFF800000> : vector<8xf32>
    %45 = vector.multi_reduction <maximumf>, %44, %cst_13 [1] : vector<8x128xf32> to vector<8xf32>
    %46 = vector.shape_cast %45 : vector<8xf32> to vector<8x1xf32>
    %47 = vector.broadcast %46 : vector<8x1xf32> to vector<8x128xf32>
    %48 = arith.subf %44, %47 : vector<8x128xf32>
    %49 = math.exp %48 : vector<8x128xf32>
    %cst_14 = arith.constant dense<0.000000e+00> : vector<8xf32>
    %50 = vector.multi_reduction <add>, %49, %cst_14 [1] : vector<8x128xf32> to vector<8xf32>
    %51 = vector.shape_cast %50 : vector<8xf32> to vector<8x1xf32>
    %52 = vector.broadcast %51 : vector<8x1xf32> to vector<8x128xf32>
    %53 = arith.divf %49, %52 : vector<8x128xf32>
    %54 = arith.subf %53, %38 : vector<8x128xf32>
    %c0_15 = arith.constant 0 : index
    %c0_16 = arith.constant 0 : index
    %55 = vector.load %arg2[%c0_15, %c0_16] : memref<128x1024xf32, #tpu.memory_space<vmem>>, vector<128x1024xf32>
    %cst_17 = arith.constant dense<0.000000e+00> : vector<8x1024xf32>
    %56 = tpu.matmul %54, %55, %cst_17 {dimension_numbers = #tpu.dot_dimension_numbers<[1], [0], [0], [1], [0, 0, 1, 1], [], []>} : vector<8x128xf32>, vector<128x1024xf32>, vector<8x1024xf32> -> vector<8x1024xf32>
    %57 = math.absf %56 : vector<8x1024xf32>
    %cst_18 = arith.constant dense<0xFF800000> : vector<8xf32>
    %58 = vector.multi_reduction <maximumf>, %57, %cst_18 [1] : vector<8x1024xf32> to vector<8xf32>
    %59 = vector.shape_cast %58 : vector<8xf32> to vector<8x1xf32>
    %cst_19 = arith.constant 9.99999996E-13 : f32
    %60 = vector.broadcast %cst_19 : f32 to vector<8x1xf32>
    %61 = arith.addf %60, %59 : vector<8x1xf32>
    %62 = tpu.reciprocal %61 {approx = true} : vector<8x1xf32> -> vector<8x1xf32>
    %63 = vector.broadcast %62 : vector<8x1xf32> to vector<8x1024xf32>
    %64 = arith.mulf %56, %63 : vector<8x1024xf32>
    %65 = arith.mulf %64, %64 : vector<8x1024xf32>
    %cst_20 = arith.constant dense<0.000000e+00> : vector<8xf32>
    %66 = vector.multi_reduction <add>, %65, %cst_20 [1] : vector<8x1024xf32> to vector<8xf32>
    %67 = vector.shape_cast %66 : vector<8xf32> to vector<8x1xf32>
    %cst_21 = arith.constant 9.99999997E-7 : f32
    %68 = vector.broadcast %cst_21 : f32 to vector<8x1xf32>
    %69 = arith.addf %68, %67 : vector<8x1xf32>
    %70 = math.rsqrt %69 : vector<8x1xf32>
    %71 = vector.broadcast %70 : vector<8x1xf32> to vector<8x1024xf32>
    %72 = arith.mulf %64, %71 : vector<8x1024xf32>
    %c0_22 = arith.constant 0 : index
    %c0_23 = arith.constant 0 : index
    %73 = vector.load %arg1[%c0_22, %c0_23] : memref<1024x128xf32, #tpu.memory_space<vmem>>, vector<1024x128xf32>
    %cst_24 = arith.constant dense<0.000000e+00> : vector<8x128xf32>
    %74 = tpu.matmul %72, %73, %cst_24 {dimension_numbers = #tpu.dot_dimension_numbers<[1], [0], [0], [1], [0, 0, 1, 1], [], []>} : vector<8x1024xf32>, vector<1024x128xf32>, vector<8x128xf32> -> vector<8x128xf32>
    %cst_25 = arith.constant 8.000000e+00 : f32
    %75 = vector.broadcast %cst_25 : f32 to vector<8x128xf32>
    %76 = arith.mulf %75, %74 : vector<8x128xf32>
    %77 = arith.addf %28, %76 : vector<8x128xf32>
    %cst_26 = arith.constant dense<0xFF800000> : vector<8xf32>
    %78 = vector.multi_reduction <maximumf>, %77, %cst_26 [1] : vector<8x128xf32> to vector<8xf32>
    %79 = vector.shape_cast %78 : vector<8xf32> to vector<8x1xf32>
    %80 = vector.broadcast %79 : vector<8x1xf32> to vector<8x128xf32>
    %81 = arith.subf %77, %80 : vector<8x128xf32>
    %82 = math.exp %81 : vector<8x128xf32>
    %cst_27 = arith.constant dense<0.000000e+00> : vector<8xf32>
    %83 = vector.multi_reduction <add>, %82, %cst_27 [1] : vector<8x128xf32> to vector<8xf32>
    %84 = vector.shape_cast %83 : vector<8xf32> to vector<8x1xf32>
    %85 = vector.broadcast %84 : vector<8x1xf32> to vector<8x128xf32>
    %86 = arith.divf %82, %85 : vector<8x128xf32>
    %87 = math.log %84 : vector<8x1xf32>
    %88 = vector.broadcast %87 : vector<8x1xf32> to vector<8x128xf32>
    %89 = arith.subf %81, %88 : vector<8x128xf32>
    %90 = arith.subf %89, %41 : vector<8x128xf32>
    %91 = arith.mulf %86, %90 : vector<8x128xf32>
    %cst_28 = arith.constant dense<0.000000e+00> : vector<8xf32>
    %92 = vector.multi_reduction <add>, %91, %cst_28 [1] : vector<8x128xf32> to vector<8xf32>
    %93 = vector.shape_cast %92 : vector<8xf32> to vector<8x1xf32>
    %94 = tpu.iota {dimensions = array<i32: 0>} : vector<8x1xi32>
    %c2_i32 = arith.constant 2 : i32
    %95 = vector.broadcast %c2_i32 : i32 to vector<8x1xi32>
    %96 = arith.cmpi slt, %94, %95 : vector<8x1xi32>
    %cst_29 = arith.constant 0.000000e+00 : f32
    %97 = vector.broadcast %cst_29 : f32 to vector<8x1xf32>
    %98 = arith.select %96, %93, %97 : vector<8x1xi1>, vector<8x1xf32>
    %cst_30 = arith.constant dense<0.000000e+00> : vector<1xf32>
    %99 = vector.multi_reduction <add>, %98, %cst_30 [0] : vector<8x1xf32> to vector<1xf32>
    %100 = vector.shape_cast %99 : vector<1xf32> to vector<1x1xf32>
    %cst_31 = arith.constant 5.000000e-01 : f32
    %101 = vector.broadcast %cst_31 : f32 to vector<1x1xf32>
    %102 = arith.mulf %100, %101 : vector<1x1xf32>
    %c0_32 = arith.constant 0 : index
    %c0_33 = arith.constant 0 : index
    %103 = vector.load %arg4[%c0_32, %c0_33] : memref<1x1xf32, #tpu.memory_space<vmem>>, vector<1x1xf32>
    tpu.vector_store %arg4[%c0_32, %c0_33], %102 {strides = array<i32>} : memref<1x1xf32, #tpu.memory_space<vmem>>, vector<1x1xf32>,
    return
  }
}

</mosaic_0001>

<bundles_post_ra>
// kernel: vat_loss.1
= control target key start
LH: loop header
LB: loop body
LE: loop exit
PB: predicated region body
PF: predicated region fallthrough
CT: control target
= control target key end

     0   :  { %9 = vsyncpa [#allocation3], 0  ;;  %s1550_s0 = inlined_call_operand.vmem [shape: f32[16,1024], index: 0, kind: input, shape index: {}]   ;;  %s1551_s1 = inlined_call_operand.hbm [shape: f32[1024,128], index: 1, kind: input, shape index: {}]   ;;  %s1552_s2 = inlined_call_operand.hbm [shape: f32[128,1024], index: 2, kind: input, shape index: {}]   ;;  %s1553_s3 = inlined_call_operand.vmem [shape: f32[1,128], index: 3, kind: input, shape index: {}]   ;;  %s1554_s4 = inlined_call_operand.hbm [shape: f32[1,1], index: 4, kind: output, shape index: {}]  }
   0x1   :  { %10 = vsyncpa [#allocation6], 0 }
   0x2   :  { %11 = vsyncpa [#allocation4], 0  ;;  %s18_s17 = sshll.u32 %s1551_s1, 4  ;;  %s1377_s18 = smov [#allocation2]   ;;  %s19_s17 = int_to_ptr.hbm [resolvable:$true] %s18_s17 }
   0x3   :  { %s20_s19 = sshll.u32 %s1377_s18, 4  ;;  %s31_s22 = sshll.u32 %s1552_s2, 4  ;;  %s21_s19 = int_to_ptr.vmem [resolvable:$true] %s20_s19  ;;  %s32_s22 = int_to_ptr.hbm [resolvable:$true] %s31_s22 }
   0x4   :  { %s1378_s23 = smov 128   ;;  %s1379_s24 = smov 8  }
   0x5   :  { %26 = dma.hbm_to_vmem [thread:$0]  %s19_s17, 16384, %s21_s19, [#allocation3], %s1378_s23, %s1378_s23, %s1379_s24  }
   0x6   :  { %s1380_s25 = smov [#allocation5]   ;;  %s1381_s27 = smov 1024  }
   0x7   :  { %s33_s26 = sshll.u32 %s1380_s25, 4  ;;  %s1382_s28 = smov 64   ;;  %s34_s26 = int_to_ptr.vmem [resolvable:$true] %s33_s26 }
   0x8   :  { %39 = dma.hbm_to_vmem [thread:$0]  %s32_s22, 16384, %s34_s26, [#allocation6], %s1381_s27, %s1381_s27, %s1382_s28  }
   0x9   :  { %1371 = dma.done.wait [#allocation3], 16384  }
   0xa   :  { %1372 = vsyncadd [#allocation3], 4294950912 }
   0xb   :  { %1373 = dma.done.wait [#allocation6], 16384  }
   0xc   :  { %1374 = vsyncadd [#allocation6], 4294950912  ;;  %v1418_v0 = vld [vmem:[%s1550_s0 + $0x40] sm:$0xff]  ;;  %v1423_v1 = vld [vmem:[%s1550_s0 + $0x48] sm:$0xff]  ;;  %s1128_s9 = sshll.u32 %s1554_s4, 4  ;;  %s1129_s9 = int_to_ptr.hbm [resolvable:$true] %s1128_s9 }
   0xd   :  { %v1428_v2 = vld [vmem:[%s1550_s0 + $0x50] sm:$0xff]  ;;  %v1433_v3 = vld [vmem:[%s1550_s0 + $0x58] sm:$0xff]  ;;  %v1438_v4 = vld [vmem:[%s1550_s0 + $0x60] sm:$0xff]  ;;  %v79_v6 = vand.u32 2147483647, %v1418_v0 }
   0xe   :  { %v1443_v5 = vld [vmem:[%s1550_s0 + $0x68] sm:$0xff]  ;;  %v1449_v7 = vld [vmem:[%s1550_s0 + $0x70] sm:$0xff]  ;;  %v1454_v8 = vld [vmem:[%s1550_s0 + $0x78] sm:$0xff]  ;;  %v80_v9 = vand.u32 2147483647, %v1423_v1 }
   0xf   :  { %v81_v10 = vand.u32 2147483647, %v1428_v2  ;;  %v82_v11 = vand.u32 2147483647, %v1433_v3  ;;  %v83_v12 = vand.u32 2147483647, %v1438_v4 }
  0x10   :  { %v84_v13 = vand.u32 2147483647, %v1443_v5  ;;  %v85_v14 = vand.u32 2147483647, %v1449_v7  ;;  %v86_v16 = vand.u32 2147483647, %v1454_v8 }
  0x11   :  { %v96_v15 = vmax.f32 %v79_v6, %v81_v10  ;;  %v97_v17 = vmax.f32 %v80_v9, %v82_v11  ;;  %v216_v23 = vld [vmem:[#allocation2 + $0x78] sm:$0xff]  ;;  %v215_v27 = vld [vmem:[#allocation2 + $0x70] sm:$0xff]  ;;  %v214_v31 = vld [vmem:[#allocation2 + $0x68] sm:$0xff] }
  0x12   :  { %v232_v24 = vld [vmem:[#allocation2 + $0xf8] sm:$0xff]  ;;  %329 = vmatpush.msra.mxu0 %v216_v23  ;;  %v231_v28 = vld [vmem:[#allocation2 + $0xf0] sm:$0xff]  ;;  %v230_v32 = vld [vmem:[#allocation2 + $0xe8] sm:$0xff] }
  0x13   :  { %v98_v18 = vmax.f32 %v96_v15, %v83_v12  ;;  %v99_v19 = vmax.f32 %v97_v17, %v84_v13  ;;  %v248_v25 = vld [vmem:[#allocation2 + $0x178] sm:$0xff]  ;;  %352 = vmatpush.msra.mxu1 %v232_v24  ;;  %v247_v29 = vld [vmem:[#allocation2 + $0x170] sm:$0xff]  ;;  %v246_v33 = vld [vmem:[#allocation2 + $0x168] sm:$0xff] }
  0x14   :  { %v264_v26 = vld [vmem:[#allocation2 + $0x1f8] sm:$0xff]  ;;  %375 = vmatpush.msra.mxu2 %v248_v25  ;;  %v263_v30 = vld [vmem:[#allocation2 + $0x1f0] sm:$0xff]  ;;  %330 = vmatpush.msra.mxu0 %v215_v27  ;;  %v262_v34 = vld [vmem:[#allocation2 + $0x1e8] sm:$0xff] }
  0x15   :  { %v100_v20 = vmax.f32 %v98_v18, %v85_v14  ;;  %v101_v21 = vmax.f32 %v99_v19, %v86_v16  ;;  %398 = vmatpush.msra.mxu3 %v264_v26  ;;  %353 = vmatpush.msra.mxu1 %v231_v28  ;;  %v213_v36 = vld [vmem:[#allocation2 + $0x60] sm:$0xff]  ;;  %v212_v41 = vld [vmem:[#allocation2 + $0x58] sm:$0xff]  ;;  %v211_v45 = vld [vmem:[#allocation2 + $0x50] sm:$0xff] }
  0x16   :  { %376 = vmatpush.msra.mxu2 %v247_v29  ;;  %v229_v37 = vld [vmem:[#allocation2 + $0xe0] sm:$0xff]  ;;  %331 = vmatpush.msra.mxu0 %v214_v31  ;;  %v228_v42 = vld [vmem:[#allocation2 + $0xd8] sm:$0xff]  ;;  %v227_v46 = vld [vmem:[#allocation2 + $0xd0] sm:$0xff] }
  0x17   :  { %v102_v22 = vmax.f32 %v100_v20, %v101_v21  ;;  %399 = vmatpush.msra.mxu3 %v263_v30  ;;  %354 = vmatpush.msra.mxu1 %v230_v32  ;;  %v245_v39 = vld [vmem:[#allocation2 + $0x160] sm:$0xff]  ;;  %v244_v43 = vld [vmem:[#allocation2 + $0x158] sm:$0xff]  ;;  %v243_v47 = vld [vmem:[#allocation2 + $0x150] sm:$0xff] }
  0x18   :  { %v261_v40 = vld [vmem:[#allocation2 + $0x1e0] sm:$0xff]  ;;  %377 = vmatpush.msra.mxu2 %v246_v33  ;;  %332 = vmatpush.msra.mxu0 %v213_v36  ;;  %v260_v44 = vld [vmem:[#allocation2 + $0x1d8] sm:$0xff]  ;;  %v259_v48 = vld [vmem:[#allocation2 + $0x1d0] sm:$0xff] }
  0x19   :  { %103 = vmax.xlane.f32.xlu0 %v102_v22  ;;  %400 = vmatpush.msra.mxu3 %v262_v34  ;;  %v210_v49 = vld [vmem:[#allocation2 + $0x48] sm:$0xff]  ;;  %v209_v54 = vld [vmem:[#allocation2 + $0x40] sm:$0xff]  ;;  %v208_v6 = vld [vmem:[#allocation2 + $0x38] sm:$0xff] }
  0x1a   :  { %355 = vmatpush.msra.mxu1 %v229_v37  ;;  %378 = vmatpush.msra.mxu2 %v245_v39  ;;  %v226_v50 = vld [vmem:[#allocation2 + $0xc8] sm:$0xff]  ;;  %v225_v58 = vld [vmem:[#allocation2 + $0xc0] sm:$0xff]  ;;  %v224_v9 = vld [vmem:[#allocation2 + $0xb8] sm:$0xff] }
  0x1b   :  { %401 = vmatpush.msra.mxu3 %v261_v40  ;;  %333 = vmatpush.msra.mxu0 %v212_v41  ;;  %v242_v51 = vld [vmem:[#allocation2 + $0x148] sm:$0xff]  ;;  %v241_v59 = vld [vmem:[#allocation2 + $0x140] sm:$0xff]  ;;  %v240_v10 = vld [vmem:[#allocation2 + $0x138] sm:$0xff] }
  0x1c   :  { %356 = vmatpush.msra.mxu1 %v228_v42  ;;  %379 = vmatpush.msra.mxu2 %v244_v43  ;;  %v258_v52 = vld [vmem:[#allocation2 + $0x1c8] sm:$0xff]  ;;  %v257_v60 = vld [vmem:[#allocation2 + $0x1c0] sm:$0xff]  ;;  %v256_v11 = vld [vmem:[#allocation2 + $0x1b8] sm:$0xff] }
  0x1d   :  { %402 = vmatpush.msra.mxu3 %v260_v44  ;;  %334 = vmatpush.msra.mxu0 %v211_v45  ;;  %v207_v15 = vld [vmem:[#allocation2 + $0x30] sm:$0xff]  ;;  %v206_v22 = vld [vmem:[#allocation2 + $0x28] sm:$0xff]  ;;  %v205_v29 = vld [vmem:[#allocation2 + $0x20] sm:$0xff] }
  0x1e   :  { %357 = vmatpush.msra.mxu1 %v227_v46  ;;  %380 = vmatpush.msra.mxu2 %v243_v47  ;;  %v223_v16 = vld [vmem:[#allocation2 + $0xb0] sm:$0xff]  ;;  %v222_v23 = vld [vmem:[#allocation2 + $0xa8] sm:$0xff]  ;;  %v221_v30 = vld [vmem:[#allocation2 + $0xa0] sm:$0xff] }
  0x1f   :  { %403 = vmatpush.msra.mxu3 %v259_v48  ;;  %335 = vmatpush.msra.mxu0 %v210_v49  ;;  %v239_v17 = vld [vmem:[#allocation2 + $0x130] sm:$0xff]  ;;  %v238_v24 = vld [vmem:[#allocation2 + $0x128] sm:$0xff]  ;;  %v237_v31 = vld [vmem:[#allocation2 + $0x120] sm:$0xff] }
  0x20   :  { %358 = vmatpush.msra.mxu1 %v226_v50  ;;  %381 = vmatpush.msra.mxu2 %v242_v51  ;;  %v255_v18 = vld [vmem:[#allocation2 + $0x1b0] sm:$0xff]  ;;  %v254_v25 = vld [vmem:[#allocation2 + $0x1a8] sm:$0xff]  ;;  %v253_v32 = vld [vmem:[#allocation2 + $0x1a0] sm:$0xff] }
  0x21   :  { %404 = vmatpush.msra.mxu3 %v258_v52  ;;  %336 = vmatpush.msra.mxu0 %v209_v54  ;;  %v204_v36 = vld [vmem:[#allocation2 + $0x18] sm:$0xff]  ;;  %v203_v42 = vld [vmem:[#allocation2 + $0x10] sm:$0xff]  ;;  %v202_v48 = vld [vmem:[#allocation2 + $0x8] sm:$0xff] }
  0x22   :  { %359 = vmatpush.msra.mxu1 %v225_v58  ;;  %382 = vmatpush.msra.mxu2 %v241_v59  ;;  %v220_v37 = vld [vmem:[#allocation2 + $0x98] sm:$0xff]  ;;  %v219_v43 = vld [vmem:[#allocation2 + $0x90] sm:$0xff]  ;;  %v218_v49 = vld [vmem:[#allocation2 + $0x88] sm:$0xff] }
  0x23   :  { %405 = vmatpush.msra.mxu3 %v257_v60  ;;  %337 = vmatpush.msra.mxu0 %v208_v6  ;;  %v252_v39 = vld [vmem:[#allocation2 + $0x198] sm:$0xff]  ;;  %v235_v44 = vld [vmem:[#allocation2 + $0x110] sm:$0xff]  ;;  %v234_v50 = vld [vmem:[#allocation2 + $0x108] sm:$0xff] }
  0x24   :  { %360 = vmatpush.msra.mxu1 %v224_v9  ;;  %383 = vmatpush.msra.mxu2 %v240_v10  ;;  %v251_v45 = vld [vmem:[#allocation2 + $0x190] sm:$0xff]  ;;  %v250_v52 = vld [vmem:[#allocation2 + $0x188] sm:$0xff]  ;;  %v201_v54 = vld [vmem:[#allocation2] sm:$0xff] }
  0x25   :  { %406 = vmatpush.msra.mxu3 %v256_v11  ;;  %338 = vmatpush.msra.mxu0 %v207_v15  ;;  %v280_v58 = vld [vmem:[#allocation2 + $0x278] sm:$0xff]  ;;  %v311_v6 = vld [vmem:[#allocation2 + $0x370] sm:$0xff]  ;;  %v278_v10 = vld [vmem:[#allocation2 + $0x268] sm:$0xff] }
  0x26   :  { %361 = vmatpush.msra.mxu1 %v223_v16  ;;  %384 = vmatpush.msra.mxu2 %v239_v17  ;;  %v296_v59 = vld [vmem:[#allocation2 + $0x2f8] sm:$0xff]  ;;  %v327_v9 = vld [vmem:[#allocation2 + $0x3f0] sm:$0xff]  ;;  %v294_v11 = vld [vmem:[#allocation2 + $0x2e8] sm:$0xff] }
  0x27   :  { %407 = vmatpush.msra.mxu3 %v255_v18  ;;  %339 = vmatpush.msra.mxu0 %v206_v22  ;;  %v312_v60 = vld [vmem:[#allocation2 + $0x378] sm:$0xff]  ;;  %v293_v15 = vld [vmem:[#allocation2 + $0x2e0] sm:$0xff]  ;;  %v275_v22 = vld [vmem:[#allocation2 + $0x250] sm:$0xff] }
  0x28   :  { %362 = vmatpush.msra.mxu1 %v222_v23  ;;  %385 = vmatpush.msra.mxu2 %v238_v24  ;;  %v309_v16 = vld [vmem:[#allocation2 + $0x360] sm:$0xff]  ;;  %v276_v18 = vld [vmem:[#allocation2 + $0x258] sm:$0xff]  ;;  %v291_v23 = vld [vmem:[#allocation2 + $0x2d0] sm:$0xff] }
  0x29   :  { %408 = vmatpush.msra.mxu3 %v254_v25  ;;  %340 = vmatpush.msra.mxu0 %v205_v29  ;;  %v325_v17 = vld [vmem:[#allocation2 + $0x3e0] sm:$0xff]  ;;  %v307_v24 = vld [vmem:[#allocation2 + $0x350] sm:$0xff]  ;;  %v322_v29 = vld [vmem:[#allocation2 + $0x3c8] sm:$0xff] }
  0x2a   :  { %363 = vmatpush.msra.mxu1 %v221_v30  ;;  %386 = vmatpush.msra.mxu2 %v237_v31  ;;  %v323_v25 = vld [vmem:[#allocation2 + $0x3d0] sm:$0xff]  ;;  %v273_v31 = vld [vmem:[#allocation2 + $0x240] sm:$0xff] }
  0x2b   :  { %409 = vmatpush.msra.mxu3 %v253_v32  ;;  %341 = vmatpush.msra.mxu0 %v204_v36  ;;  %v52_v30 = vld [vmem:[%s1550_s0 + $0x10] sm:$0xff]  ;;  %v289_v32 = vld [vmem:[#allocation2 + $0x2c0] sm:$0xff]  ;;  %v51_v36 = vld [vmem:[%s1550_s0 + $0x8] sm:$0xff] }
  0x2c   :  { %364 = vmatpush.msra.mxu1 %v220_v37  ;;  %v53_v37 = vld [vmem:[%s1550_s0 + $0x18] sm:$0xff] }
  0x2d   :  { %410 = vmatpush.msra.mxu3 %v252_v39  ;;  %342 = vmatpush.msra.mxu0 %v203_v42  ;;  %v288_v39 = vld [vmem:[#allocation2 + $0x2b8] sm:$0xff]  ;;  %v271_v42 = vld [vmem:[#allocation2 + $0x230] sm:$0xff] }
  0x2e   :  { %365 = vmatpush.msra.mxu1 %v219_v43  ;;  %v287_v43 = vld [vmem:[#allocation2 + $0x2b0] sm:$0xff] }
  0x2f   :  { %411 = vmatpush.msra.mxu3 %v251_v45  ;;  %343 = vmatpush.msra.mxu0 %v202_v48  ;;  %v319_v45 = vld [vmem:[#allocation2 + $0x3b0] sm:$0xff]  ;;  %v302_v48 = vld [vmem:[#allocation2 + $0x328] sm:$0xff] }
  0x30   :  { %366 = vmatpush.msra.mxu1 %v218_v49  ;;  %v318_v49 = vld [vmem:[#allocation2 + $0x3a8] sm:$0xff] }
  0x31   :  { %412 = vmatpush.msra.mxu3 %v250_v52  ;;  %344 = vmatpush.msra.mxu0 %v201_v54  ;;  %v301_v52 = vld [vmem:[#allocation2 + $0x320] sm:$0xff] }
  0x32   :  { %v317_v54 = vld [vmem:[#allocation2 + $0x3a0] sm:$0xff] }
  0x33   :  { %421 = vmatpush.msrb.mxu0 %v280_v58  ;;  %v316_v58 = vld [vmem:[#allocation2 + $0x398] sm:$0xff] }
  0x8c   :  { %v104_v35 = vpop.xlane.xlu0 %103 }
  0x8d   :  { %v106_v38 = vadd.f32 1e-12, %v104_v35 }
  0x8f   :  { %1147 = vrcp.f32 %v106_v38  ;;  %v236_v38 = vld [vmem:[#allocation2 + $0x118] sm:$0xff] }
  0x90   :  { %387 = vmatpush.msra.mxu2 %v236_v38  ;;  %v272_v38 = vld [vmem:[#allocation2 + $0x238] sm:$0xff] }
  0x92   :  { %388 = vmatpush.msra.mxu2 %v235_v44  ;;  %v303_v44 = vld [vmem:[#allocation2 + $0x330] sm:$0xff] }
  0x94   :  { %389 = vmatpush.msra.mxu2 %v234_v50  ;;  %v269_v50 = vld [vmem:[#allocation2 + $0x220] sm:$0xff] }
  0x95   :  { %v1463_v53 = vpop.eup %1147 }
  0x96   :  { %v117_v55 = vmul.f32 %v1463_v53, %v1418_v0  ;;  %v118_v56 = vmul.f32 %v1463_v53, %v1423_v1  ;;  %v119_v57 = vmul.f32 %v1463_v53, %v1428_v2  ;;  %v120_v61 = vmul.f32 %v1463_v53, %v1433_v3 }
  0x97   :  { %v121_v12 = vmul.f32 %v1463_v53, %v1438_v4  ;;  %v122_v19 = vmul.f32 %v1463_v53, %v1443_v5  ;;  %v123_v26 = vmul.f32 %v1463_v53, %v1449_v7  ;;  %v124_v33 = vmul.f32 %v1463_v53, %v1454_v8 }
  0x98   :  { %v133_v62 = vmul.f32 %v117_v55, %v117_v55  ;;  %v134_v63 = vmul.f32 %v118_v56, %v118_v56  ;;  %v135_v13 = vmul.f32 %v119_v57, %v119_v57  ;;  %v136_v20 = vmul.f32 %v120_v61, %v120_v61  ;;  %v217_v55 = vld [vmem:[#allocation2 + $0x80] sm:$0xff]  ;;  %v328_v61 = vld [vmem:[#allocation2 + $0x3f8] sm:$0xff] }
  0x99   :  { %v137_v27 = vmul.f32 %v121_v12, %v121_v12  ;;  %v138_v34 = vmul.f32 %v122_v19, %v122_v19  ;;  %v139_v40 = vmul.f32 %v123_v26, %v123_v26  ;;  %v140_v46 = vmul.f32 %v124_v33, %v124_v33  ;;  %v233_v56 = vld [vmem:[#allocation2 + $0x100] sm:$0xff]  ;;  %367 = vmatpush.msra.mxu1 %v217_v55  ;;  %v310_v12 = vld [vmem:[#allocation2 + $0x368] sm:$0xff]  ;;  %v292_v19 = vld [vmem:[#allocation2 + $0x2d8] sm:$0xff] }
  0x9a   :  { %v150_v14 = vadd.f32 %v134_v63, %v133_v62  ;;  %v249_v57 = vld [vmem:[#allocation2 + $0x180] sm:$0xff]  ;;  %390 = vmatpush.msra.mxu2 %v233_v56  ;;  %v279_v62 = vld [vmem:[#allocation2 + $0x270] sm:$0xff]  ;;  %v274_v26 = vld [vmem:[#allocation2 + $0x248] sm:$0xff]  ;;  %368 = vmatmul.f32.vlgmr.msra.gmra.mxu1 %v51_v36 }
  0x9b   :  { %413 = vmatpush.msra.mxu3 %v249_v57  ;;  %444 = vmatpush.msrb.mxu1 %v296_v59  ;;  %v295_v63 = vld [vmem:[#allocation2 + $0x2f0] sm:$0xff]  ;;  %v305_v33 = vld [vmem:[#allocation2 + $0x340] sm:$0xff]  ;;  %v268_v55 = vld [vmem:[#allocation2 + $0x218] sm:$0xff] }
  0x9c   :  { %v151_v21 = vadd.f32 %v150_v14, %v135_v13  ;;  %467 = vmatpush.msrb.mxu2 %v312_v60  ;;  %422 = vmatpush.msrb.mxu0 %v279_v62  ;;  %v326_v13 = vld [vmem:[#allocation2 + $0x3e8] sm:$0xff]  ;;  %v277_v14 = vld [vmem:[#allocation2 + $0x260] sm:$0xff]  ;;  %v284_v56 = vld [vmem:[#allocation2 + $0x298] sm:$0xff] }
  0x9d   :  { %490 = vmatpush.msrb.mxu3 %v328_v61  ;;  %445 = vmatpush.msrb.mxu1 %v295_v63  ;;  %v300_v57 = vld [vmem:[#allocation2 + $0x318] sm:$0xff]  ;;  %v267_v59 = vld [vmem:[#allocation2 + $0x210] sm:$0xff]  ;;  %v266_v63 = vld [vmem:[#allocation2 + $0x208] sm:$0xff] }
  0x9e   :  { %v152_v28 = vadd.f32 %v151_v21, %v136_v20  ;;  %468 = vmatpush.msrb.mxu2 %v311_v6  ;;  %423 = vmatpush.msrb.mxu0 %v278_v10  ;;  %v308_v20 = vld [vmem:[#allocation2 + $0x358] sm:$0xff]  ;;  %v283_v60 = vld [vmem:[#allocation2 + $0x290] sm:$0xff]  ;;  %v282_v6 = vld [vmem:[#allocation2 + $0x288] sm:$0xff] }
  0x9f   :  { %491 = vmatpush.msrb.mxu3 %v327_v9  ;;  %446 = vmatpush.msrb.mxu1 %v294_v11  ;;  %v324_v21 = vld [vmem:[#allocation2 + $0x3d8] sm:$0xff]  ;;  %v299_v61 = vld [vmem:[#allocation2 + $0x310] sm:$0xff]  ;;  %v298_v10 = vld [vmem:[#allocation2 + $0x308] sm:$0xff] }
  0xa0   :  { %v153_v35 = vadd.f32 %v152_v28, %v137_v27  ;;  %469 = vmatpush.msrb.mxu2 %v310_v12  ;;  %424 = vmatpush.msrb.mxu0 %v277_v14  ;;  %v290_v27 = vld [vmem:[#allocation2 + $0x2c8] sm:$0xff]  ;;  %v315_v62 = vld [vmem:[#allocation2 + $0x390] sm:$0xff]  ;;  %v281_v14 = vld [vmem:[#allocation2 + $0x280] sm:$0xff] }
  0xa1   :  { %492 = vmatpush.msrb.mxu3 %v326_v13  ;;  %447 = vmatpush.msrb.mxu1 %v293_v15  ;;  %v306_v28 = vld [vmem:[#allocation2 + $0x348] sm:$0xff]  ;;  %v265_v13 = vld [vmem:[#allocation2 + $0x200] sm:$0xff] }
  0xa2   :  { %v154_v41 = vadd.f32 %v153_v35, %v138_v34  ;;  %470 = vmatpush.msrb.mxu2 %v309_v16  ;;  %425 = vmatpush.msrb.mxu0 %v276_v18  ;;  %v321_v34 = vld [vmem:[#allocation2 + $0x3c0] sm:$0xff]  ;;  %v314_v11 = vld [vmem:[#allocation2 + $0x388] sm:$0xff] }
  0xa3   :  { %493 = vmatpush.msrb.mxu3 %v325_v17  ;;  %448 = vmatpush.msrb.mxu1 %v292_v19  ;;  %v50_v35 = vld [vmem:[%s1550_s0] sm:$0xff] }
  0xa4   :  { %v155_v47 = vadd.f32 %v154_v41, %v139_v40  ;;  %471 = vmatpush.msrb.mxu2 %v308_v20  ;;  %426 = vmatpush.msrb.mxu0 %v275_v22  ;;  %v304_v40 = vld [vmem:[#allocation2 + $0x338] sm:$0xff]  ;;  %v297_v15 = vld [vmem:[#allocation2 + $0x300] sm:$0xff] }
  0xa5   :  { %494 = vmatpush.msrb.mxu3 %v324_v21  ;;  %449 = vmatpush.msrb.mxu1 %v291_v23  ;;  %v320_v41 = vld [vmem:[#allocation2 + $0x3b8] sm:$0xff]  ;;  %v313_v16 = vld [vmem:[#allocation2 + $0x380] sm:$0xff] }
  0xa6   :  { %v156_v51 = vadd.f32 %v155_v47, %v140_v46  ;;  %472 = vmatpush.msrb.mxu2 %v307_v24  ;;  %427 = vmatpush.msrb.mxu0 %v274_v26  ;;  %v270_v46 = vld [vmem:[#allocation2 + $0x228] sm:$0xff] }
  0xa7   :  { %495 = vmatpush.msrb.mxu3 %v323_v25  ;;  %450 = vmatpush.msrb.mxu1 %v290_v27  ;;  %v286_v47 = vld [vmem:[#allocation2 + $0x2a8] sm:$0xff] }
  0xa8   :  { %157 = vadd.xlane.f32.xlu0 %v156_v51  ;;  %473 = vmatpush.msrb.mxu2 %v306_v28  ;;  %v285_v51 = vld [vmem:[#allocation2 + $0x2a0] sm:$0xff] }
  0xa9   :  { %496 = vmatpush.msrb.mxu3 %v322_v29  ;;  %391 = vmatmul.f32.vlgmr.msra.gmra.mxu2 %v52_v30  ;;  %v54_v29 = vld [vmem:[%s1550_s0 + $0x20] sm:$0xff] }
  0xaa   :  { %428 = vmatpush.msrb.mxu0 %v273_v31  ;;  %451 = vmatpush.msrb.mxu1 %v289_v32 }
  0xab   :  { %474 = vmatpush.msrb.mxu2 %v305_v33  ;;  %497 = vmatpush.msrb.mxu3 %v321_v34 }
  0xac   :  { %345 = vmatmul.f32.vlgmr.msra.gmra.mxu0 %v50_v35  ;;  %414 = vmatmul.f32.vlgmr.msra.gmra.mxu3 %v53_v37 }
  0xad   :  { %429 = vmatpush.msrb.mxu0 %v272_v38  ;;  %452 = vmatpush.msrb.mxu1 %v288_v39 }
  0xae   :  { %475 = vmatpush.msrb.mxu2 %v304_v40  ;;  %498 = vmatpush.msrb.mxu3 %v320_v41 }
  0xaf   :  { %430 = vmatpush.msrb.mxu0 %v271_v42  ;;  %453 = vmatpush.msrb.mxu1 %v287_v43 }
  0xb0   :  { %476 = vmatpush.msrb.mxu2 %v303_v44  ;;  %499 = vmatpush.msrb.mxu3 %v319_v45 }
  0xb1   :  { %431 = vmatpush.msrb.mxu0 %v270_v46  ;;  %454 = vmatpush.msrb.mxu1 %v286_v47 }
  0xb2   :  { %477 = vmatpush.msrb.mxu2 %v302_v48  ;;  %500 = vmatpush.msrb.mxu3 %v318_v49  ;;  %v1146_v49 = vld [vmem:[%s1553_s3] ss:$0 sm:$0xff]  ;;  %s1383_s3 = smov [#allocation7]  }
  0xb3   :  { %432 = vmatpush.msrb.mxu0 %v269_v50  ;;  %455 = vmatpush.msrb.mxu1 %v285_v51  ;;  %s1126_s6 = sshll.u32 %s1383_s3, 4  ;;  %s1127_s6 = int_to_ptr.vmem [resolvable:$true] %s1126_s6 }
  0xb4   :  { %478 = vmatpush.msrb.mxu2 %v301_v52  ;;  %501 = vmatpush.msrb.mxu3 %v317_v54 }
  0xb5   :  { %433 = vmatpush.msrb.mxu0 %v268_v55  ;;  %456 = vmatpush.msrb.mxu1 %v284_v56 }
  0xb6   :  { %479 = vmatpush.msrb.mxu2 %v300_v57  ;;  %502 = vmatpush.msrb.mxu3 %v316_v58 }
  0xb7   :  { %434 = vmatpush.msrb.mxu0 %v267_v59  ;;  %457 = vmatpush.msrb.mxu1 %v283_v60 }
  0xb8   :  { %480 = vmatpush.msrb.mxu2 %v299_v61  ;;  %503 = vmatpush.msrb.mxu3 %v315_v62 }
  0xb9   :  { %435 = vmatpush.msrb.mxu0 %v266_v63  ;;  %458 = vmatpush.msrb.mxu1 %v282_v6  ;;  %v688_v63 = vld [vmem:[#allocation5 + $0x3c0] sm:$0xff]  ;;  %v689_v6 = vld [vmem:[#allocation5 + $0x3c8] sm:$0xff] }
  0xba   :  { %481 = vmatpush.msrb.mxu2 %v298_v10  ;;  %504 = vmatpush.msrb.mxu3 %v314_v11  ;;  %v691_v10 = vld [vmem:[#allocation5 + $0x3d8] sm:$0xff]  ;;  %v680_v11 = vld [vmem:[#allocation5 + $0x380] sm:$0xff] }
  0xbb   :  { %436 = vmatpush.msrb.mxu0 %v265_v13  ;;  %459 = vmatpush.msrb.mxu1 %v281_v14  ;;  %v682_v13 = vld [vmem:[#allocation5 + $0x390] sm:$0xff]  ;;  %v683_v14 = vld [vmem:[#allocation5 + $0x398] sm:$0xff] }
  0xbc   :  { %482 = vmatpush.msrb.mxu2 %v297_v15  ;;  %505 = vmatpush.msrb.mxu3 %v313_v16  ;;  %v672_v15 = vld [vmem:[#allocation5 + $0x340] sm:$0xff]  ;;  %v673_v16 = vld [vmem:[#allocation5 + $0x348] sm:$0xff] }
  0xbd   :  { %696 = vmatpush.msra.mxu0 %v688_v63  ;;  %716 = vmatpush.msra.mxu1 %v689_v6  ;;  %v587_v63 = vld [vmem:[#allocation5 + $0x98] sm:$0xff]  ;;  %v576_v6 = vld [vmem:[#allocation5 + $0x40] sm:$0xff] }
  0xbe   :  { %756 = vmatpush.msra.mxu3 %v691_v10  ;;  %v578_v10 = vld [vmem:[#allocation5 + $0x50] sm:$0xff] }
  0xbf   :  { %697 = vmatpush.msra.mxu0 %v680_v11  ;;  %v579_v11 = vld [vmem:[#allocation5 + $0x58] sm:$0xff] }
  0xc0   :  { %757 = vmatpush.msra.mxu3 %v683_v14  ;;  %v570_v14 = vld [vmem:[#allocation5 + $0x10] sm:$0xff] }
  0xc1   :  { %698 = vmatpush.msra.mxu0 %v672_v15  ;;  %v571_v15 = vld [vmem:[#allocation5 + $0x18] sm:$0xff] }
 0x117   :  { %v369_v33 = vpop.f32.mrf.mxu1 }
 0x11b   :  { %v158_v9 = vpop.xlane.xlu0 %157 }
 0x11c   :  { %v160_v12 = vadd.f32 1e-06, %v158_v9  ;;  %v690_v9 = vld [vmem:[#allocation5 + $0x3d0] sm:$0xff] }
 0x11d   :  { %736 = vmatpush.msra.mxu2 %v690_v9  ;;  %v577_v9 = vld [vmem:[#allocation5 + $0x48] sm:$0xff] }
 0x11e   :  { %1149 = vrsqrt.f32 %v160_v12  ;;  %vm177_vm1 = vweird.f32 %v160_v12 }
 0x11f   :  { %737 = vmatpush.msra.mxu2 %v682_v13  ;;  %v569_v13 = vld [vmem:[#allocation5 + $0x8] sm:$0xff] }
 0x124   :  { %v1150_v17 = vpop.eup %1149 }
 0x125   :  { %v172_v18 = vmul.f32 %v1150_v17, %v160_v12  ;;  %vm178_vm0 = vweird.f32 %v1150_v17  ;;  %v681_v12 = vld [vmem:[#allocation5 + $0x388] sm:$0xff] }
 0x126   :  { %vm179_vm2 = vmor %vm177_vm1, %vm178_vm0  ;;  %717 = vmatpush.msra.mxu1 %v681_v12  ;;  %v568_v12 = vld [vmem:[#allocation5] sm:$0xff] }
 0x127   :  { %v173_v19 = vmul.f32 %v1150_v17, %v172_v18  ;;  %v675_v18 = vld [vmem:[#allocation5 + $0x358] sm:$0xff] }
 0x128   :  { %718 = vmatpush.msra.mxu1 %v673_v16  ;;  %758 = vmatpush.msra.mxu3 %v675_v18  ;;  %v692_v16 = vld [vmem:[#allocation5 + $0x3e0] sm:$0xff]  ;;  %v694_v18 = vld [vmem:[#allocation5 + $0x3f0] sm:$0xff] }
 0x129   :  { %v174_v20 = vmul.f32 0.5, %v173_v19  ;;  %v346_v32 = vpop.f32.mrf.mxu0  ;;  %v664_v19 = vld [vmem:[#allocation5 + $0x300] sm:$0xff] }
 0x12a   :  { %v370_v36 = vadd.f32 %v369_v33, %v346_v32  ;;  %699 = vmatpush.msra.mxu0 %v664_v19  ;;  %v632_v32 = vld [vmem:[#allocation5 + $0x200] sm:$0xff]  ;;  %v633_v33 = vld [vmem:[#allocation5 + $0x208] sm:$0xff]  ;;  %v695_v19 = vld [vmem:[#allocation5 + $0x3f8] sm:$0xff] }
 0x12b   :  { %v175_v21 = vsub.f32 1.5, %v174_v20  ;;  %v665_v20 = vld [vmem:[#allocation5 + $0x308] sm:$0xff] }
 0x12c   :  { %v392_v35 = vpop.f32.mrf.mxu2  ;;  %719 = vmatpush.msra.mxu1 %v665_v20  ;;  %v684_v20 = vld [vmem:[#allocation5 + $0x3a0] sm:$0xff] }
 0x12d   :  { %v176_v22 = vmul.f32 %v1150_v17, %v175_v21  ;;  %v393_v39 = vadd.f32 %v392_v35, %v370_v36  ;;  %v666_v21 = vld [vmem:[#allocation5 + $0x310] sm:$0xff]  ;;  %v635_v36 = vld [vmem:[#allocation5 + $0x218] sm:$0xff] }
 0x12e   :  { %v634_v35 = vld [vmem:[#allocation5 + $0x210] sm:$0xff] }
 0x12f   :  { %v180_v23 = vsel %vm179_vm2, %v1150_v17, %v176_v22  ;;  %v415_v34 = vpop.f32.mrf.mxu3  ;;  %v674_v17 = vld [vmem:[#allocation5 + $0x350] sm:$0xff]  ;;  %v667_v22 = vld [vmem:[#allocation5 + $0x318] sm:$0xff] }
 0x130   :  { %v182_v24 = vmul.f32 %v1463_v53, %v180_v23  ;;  %v55_v53 = vld [vmem:[%s1550_s0 + $0x28] sm:$0xff]  ;;  %v416_v41 = vadd.f32 %v415_v34, %v393_v39  ;;  %738 = vmatpush.msra.mxu2 %v674_v17  ;;  %v656_v23 = vld [vmem:[#allocation5 + $0x2c0] sm:$0xff]  ;;  %759 = vmatpush.msra.mxu3 %v667_v22  ;;  %v626_v39 = vld [vmem:[#allocation5 + $0x1d0] sm:$0xff] }
 0x131   :  { %700 = vmatpush.msra.mxu0 %v656_v23  ;;  %v693_v17 = vld [vmem:[#allocation5 + $0x3e8] sm:$0xff]  ;;  %v686_v22 = vld [vmem:[#allocation5 + $0x3b0] sm:$0xff]  ;;  %v687_v23 = vld [vmem:[#allocation5 + $0x3b8] sm:$0xff] }
 0x132   :  { %v193_v25 = vmul.f32 %v182_v24, %v1418_v0  ;;  %v194_v26 = vmul.f32 %v182_v24, %v1423_v1  ;;  %v195_v27 = vmul.f32 %v182_v24, %v1428_v2  ;;  %v196_v28 = vmul.f32 %v182_v24, %v1433_v3  ;;  %v56_v0 = vld [vmem:[%s1550_s0 + $0x30] sm:$0xff]  ;;  %v57_v1 = vld [vmem:[%s1550_s0 + $0x38] sm:$0xff]  ;;  %739 = vmatpush.msra.mxu2 %v666_v21  ;;  %v685_v21 = vld [vmem:[#allocation5 + $0x3a8] sm:$0xff] }
 0x133   :  { %v197_v2 = vmul.f32 %v182_v24, %v1438_v4  ;;  %v198_v3 = vmul.f32 %v182_v24, %v1443_v5  ;;  %v199_v30 = vmul.f32 %v182_v24, %v1449_v7  ;;  %v200_v31 = vmul.f32 %v182_v24, %v1454_v8  ;;  %v657_v24 = vld [vmem:[#allocation5 + $0x2c8] sm:$0xff] }
 0x134   :  { %348 = vmatmul.f32.gmra.mxu0 %v193_v25  ;;  %371 = vmatmul.f32.gmra.mxu1 %v194_v26  ;;  %v658_v25 = vld [vmem:[#allocation5 + $0x2d0] sm:$0xff]  ;;  %v659_v26 = vld [vmem:[#allocation5 + $0x2d8] sm:$0xff] }
 0x135   :  { %394 = vmatmul.f32.gmra.mxu2 %v195_v27  ;;  %417 = vmatmul.f32.gmra.mxu3 %v196_v28  ;;  %v648_v27 = vld [vmem:[#allocation5 + $0x280] sm:$0xff]  ;;  %v649_v28 = vld [vmem:[#allocation5 + $0x288] sm:$0xff] }
 0x136   :  { %720 = vmatpush.msra.mxu1 %v657_v24  ;;  %740 = vmatpush.msra.mxu2 %v658_v25  ;;  %v676_v24 = vld [vmem:[#allocation5 + $0x360] sm:$0xff]  ;;  %v677_v25 = vld [vmem:[#allocation5 + $0x368] sm:$0xff] }
 0x137   :  { %760 = vmatpush.msra.mxu3 %v659_v26  ;;  %701 = vmatpush.msra.mxu0 %v648_v27  ;;  %v678_v26 = vld [vmem:[#allocation5 + $0x370] sm:$0xff]  ;;  %v679_v27 = vld [vmem:[#allocation5 + $0x378] sm:$0xff] }
 0x138   :  { %721 = vmatpush.msra.mxu1 %v649_v28  ;;  %v668_v28 = vld [vmem:[#allocation5 + $0x320] sm:$0xff] }
 0x13c   :  { %437 = vmatmul.f32.vlgmr.msrb.gmra.mxu0 %v54_v29  ;;  %460 = vmatmul.f32.vlgmr.msrb.gmra.mxu1 %v55_v53  ;;  %v650_v29 = vld [vmem:[#allocation5 + $0x290] sm:$0xff]  ;;  %v651_v53 = vld [vmem:[#allocation5 + $0x298] sm:$0xff] }
 0x13d   :  { %483 = vmatmul.f32.vlgmr.msrb.gmra.mxu2 %v56_v0  ;;  %506 = vmatmul.f32.vlgmr.msrb.gmra.mxu3 %v57_v1  ;;  %v640_v1 = vld [vmem:[#allocation5 + $0x240] sm:$0xff] }
 0x13e   :  { %741 = vmatpush.msra.mxu2 %v650_v29  ;;  %761 = vmatpush.msra.mxu3 %v651_v53  ;;  %v669_v29 = vld [vmem:[#allocation5 + $0x328] sm:$0xff]  ;;  %v670_v53 = vld [vmem:[#allocation5 + $0x330] sm:$0xff] }
 0x13f   :  { %702 = vmatpush.msra.mxu0 %v640_v1  ;;  %v660_v1 = vld [vmem:[#allocation5 + $0x2e0] sm:$0xff] }
 0x141   :  { %703 = vmatpush.msra.mxu0 %v632_v32  ;;  %v652_v32 = vld [vmem:[#allocation5 + $0x2a0] sm:$0xff] }
 0x144   :  { %440 = vmatmul.f32.gmra.mxu0 %v197_v2  ;;  %463 = vmatmul.f32.gmra.mxu1 %v198_v3  ;;  %v641_v2 = vld [vmem:[#allocation5 + $0x248] sm:$0xff] }
 0x145   :  { %486 = vmatmul.f32.gmra.mxu2 %v199_v30  ;;  %509 = vmatmul.f32.gmra.mxu3 %v200_v31  ;;  %v642_v30 = vld [vmem:[#allocation5 + $0x250] sm:$0xff]  ;;  %v643_v31 = vld [vmem:[#allocation5 + $0x258] sm:$0xff] }
 0x146   :  { %722 = vmatpush.msra.mxu1 %v641_v2  ;;  %742 = vmatpush.msra.mxu2 %v642_v30  ;;  %v661_v2 = vld [vmem:[#allocation5 + $0x2e8] sm:$0xff]  ;;  %v662_v30 = vld [vmem:[#allocation5 + $0x2f0] sm:$0xff] }
 0x147   :  { %762 = vmatpush.msra.mxu3 %v643_v31  ;;  %v663_v31 = vld [vmem:[#allocation5 + $0x2f8] sm:$0xff] }
 0x148   :  { %723 = vmatpush.msra.mxu1 %v633_v33  ;;  %743 = vmatpush.msra.mxu2 %v634_v35  ;;  %v653_v33 = vld [vmem:[#allocation5 + $0x2a8] sm:$0xff]  ;;  %v655_v35 = vld [vmem:[#allocation5 + $0x2b8] sm:$0xff] }
 0x149   :  { %763 = vmatpush.msra.mxu3 %v635_v36  ;;  %v644_v36 = vld [vmem:[#allocation5 + $0x260] sm:$0xff] }
 0x14a   :  { %744 = vmatpush.msra.mxu2 %v626_v39  ;;  %v647_v39 = vld [vmem:[#allocation5 + $0x278] sm:$0xff] }
 0x1b1   :  { %v349_v37 = vpop.f32.mrf.mxu0  ;;  %v372_v38 = vpop.f32.mrf.mxu1 }
 0x1b2   :  { %v373_v42 = vadd.f32 %v372_v38, %v349_v37  ;;  %v624_v37 = vld [vmem:[#allocation5 + $0x1c0] sm:$0xff]  ;;  %v625_v38 = vld [vmem:[#allocation5 + $0x1c8] sm:$0xff] }
 0x1b3   :  { %704 = vmatpush.msra.mxu0 %v624_v37  ;;  %724 = vmatpush.msra.mxu1 %v625_v38  ;;  %v645_v37 = vld [vmem:[#allocation5 + $0x268] sm:$0xff]  ;;  %v646_v38 = vld [vmem:[#allocation5 + $0x270] sm:$0xff] }
 0x1b8   :  { %v395_v40 = vpop.f32.mrf.mxu2  ;;  %v418_v4 = vpop.f32.mrf.mxu3 }
 0x1b9   :  { %v438_v5 = vpop.f32.mrf.mxu0  ;;  %v461_v43 = vpop.f32.mrf.mxu1  ;;  %v396_v8 = vadd.f32 %v395_v40, %v373_v42  ;;  %v627_v40 = vld [vmem:[#allocation5 + $0x1d8] sm:$0xff] }
 0x1ba   :  { %v439_v7 = vadd.f32 %v438_v5, %v416_v41  ;;  %v617_v41 = vld [vmem:[#allocation5 + $0x188] sm:$0xff]  ;;  %v618_v5 = vld [vmem:[#allocation5 + $0x190] sm:$0xff]  ;;  %v619_v42 = vld [vmem:[#allocation5 + $0x198] sm:$0xff]  ;;  %764 = vmatpush.msra.mxu3 %v627_v40 }
 0x1bb   :  { %v419_v47 = vadd.f32 %v418_v4, %v396_v8  ;;  %v616_v4 = vld [vmem:[#allocation5 + $0x180] sm:$0xff]  ;;  %725 = vmatpush.msra.mxu1 %v617_v41  ;;  %v610_v8 = vld [vmem:[#allocation5 + $0x150] sm:$0xff]  ;;  %745 = vmatpush.msra.mxu2 %v618_v5  ;;  %v639_v5 = vld [vmem:[#allocation5 + $0x238] sm:$0xff] }
 0x1bc   :  { %v462_v44 = vadd.f32 %v461_v43, %v439_v7  ;;  %v608_v7 = vld [vmem:[#allocation5 + $0x140] sm:$0xff]  ;;  %v609_v43 = vld [vmem:[#allocation5 + $0x148] sm:$0xff]  ;;  %705 = vmatpush.msra.mxu0 %v616_v4  ;;  %765 = vmatpush.msra.mxu3 %v619_v42  ;;  %v638_v41 = vld [vmem:[#allocation5 + $0x230] sm:$0xff] }
 0x1bd   :  { %726 = vmatpush.msra.mxu1 %v609_v43  ;;  %746 = vmatpush.msra.mxu2 %v610_v8  ;;  %v636_v40 = vld [vmem:[#allocation5 + $0x220] sm:$0xff]  ;;  %v637_v4 = vld [vmem:[#allocation5 + $0x228] sm:$0xff]  ;;  %v630_v43 = vld [vmem:[#allocation5 + $0x1f0] sm:$0xff] }
 0x1be   :  { %706 = vmatpush.msra.mxu0 %v608_v7  ;;  %v628_v42 = vld [vmem:[#allocation5 + $0x1e0] sm:$0xff]  ;;  %v629_v7 = vld [vmem:[#allocation5 + $0x1e8] sm:$0xff]  ;;  %v631_v8 = vld [vmem:[#allocation5 + $0x1f8] sm:$0xff] }
 0x1c0   :  { %v484_v45 = vpop.f32.mrf.mxu2  ;;  %v507_v46 = vpop.f32.mrf.mxu3 }
 0x1c1   :  { %v485_v48 = vadd.f32 %v484_v45, %v462_v44  ;;  %v441_v50 = vpop.f32.mrf.mxu0  ;;  %v464_v55 = vpop.f32.mrf.mxu1  ;;  %v611_v45 = vld [vmem:[#allocation5 + $0x158] sm:$0xff] }
 0x1c2   :  { %v442_v52 = vadd.f32 %v441_v50, %v419_v47  ;;  %v602_v50 = vld [vmem:[#allocation5 + $0x110] sm:$0xff]  ;;  %766 = vmatpush.msra.mxu3 %v611_v45  ;;  %v621_v45 = vld [vmem:[#allocation5 + $0x1a8] sm:$0xff] }
 0x1c3   :  { %v508_v51 = vadd.f32 %v507_v46, %v485_v48  ;;  %v600_v46 = vld [vmem:[#allocation5 + $0x100] sm:$0xff]  ;;  %747 = vmatpush.msra.mxu2 %v602_v50  ;;  %v613_v50 = vld [vmem:[#allocation5 + $0x168] sm:$0xff] }
 0x1c4   :  { %v465_v56 = vadd.f32 %v464_v55, %v442_v52  ;;  %707 = vmatpush.msra.mxu0 %v600_v46  ;;  %v622_v46 = vld [vmem:[#allocation5 + $0x1b0] sm:$0xff] }
 0x1c5   :  { %v1517_v54 = vadd.f32 %v1146_v49, %v508_v51  ;;  %v601_v49 = vld [vmem:[#allocation5 + $0x108] sm:$0xff]  ;;  %v603_v51 = vld [vmem:[#allocation5 + $0x118] sm:$0xff] }
 0x1c6   :  { %727 = vmatpush.msra.mxu1 %v601_v49  ;;  %767 = vmatpush.msra.mxu3 %v603_v51  ;;  %v612_v49 = vld [vmem:[#allocation5 + $0x160] sm:$0xff]  ;;  %v614_v51 = vld [vmem:[#allocation5 + $0x170] sm:$0xff] }
 0x1c7   :  { %518 = vmax.xlane.f32.xlu1 %v1517_v54 }
 0x1c8   :  { %v487_v57 = vpop.f32.mrf.mxu2  ;;  %v510_v59 = vpop.f32.mrf.mxu3 }
 0x1c9   :  { %v488_v58 = vadd.f32 %v487_v57, %v465_v56  ;;  %v592_v56 = vld [vmem:[#allocation5 + $0xc0] sm:$0xff]  ;;  %v593_v57 = vld [vmem:[#allocation5 + $0xc8] sm:$0xff] }
 0x1ca   :  { %708 = vmatpush.msra.mxu0 %v592_v56  ;;  %728 = vmatpush.msra.mxu1 %v593_v57  ;;  %v604_v56 = vld [vmem:[#allocation5 + $0x120] sm:$0xff]  ;;  %v605_v57 = vld [vmem:[#allocation5 + $0x128] sm:$0xff] }
 0x1cb   :  { %v511_v60 = vadd.f32 %v510_v59, %v488_v58  ;;  %v594_v58 = vld [vmem:[#allocation5 + $0xd0] sm:$0xff]  ;;  %v595_v59 = vld [vmem:[#allocation5 + $0xd8] sm:$0xff] }
 0x1cc   :  { %748 = vmatpush.msra.mxu2 %v594_v58  ;;  %768 = vmatpush.msra.mxu3 %v595_v59  ;;  %v606_v58 = vld [vmem:[#allocation5 + $0x130] sm:$0xff]  ;;  %v607_v59 = vld [vmem:[#allocation5 + $0x138] sm:$0xff] }
 0x1cd   :  { %v543_v61 = vmul.f32 1e-06, %v511_v60  ;;  %v584_v60 = vld [vmem:[#allocation5 + $0x80] sm:$0xff] }
 0x1ce   :  { %709 = vmatpush.msra.mxu0 %v584_v60  ;;  %769 = vmatpush.msra.mxu3 %v587_v63  ;;  %v598_v63 = vld [vmem:[#allocation5 + $0xf0] sm:$0xff] }
 0x1cf   :  { %v1521_v62 = vadd.f32 %v543_v61, %v1517_v54  ;;  %v585_v61 = vld [vmem:[#allocation5 + $0x88] sm:$0xff] }
 0x1d0   :  { %729 = vmatpush.msra.mxu1 %v585_v61  ;;  %710 = vmatpush.msra.mxu0 %v576_v6  ;;  %v596_v61 = vld [vmem:[#allocation5 + $0xe0] sm:$0xff]  ;;  %v599_v6 = vld [vmem:[#allocation5 + $0xf8] sm:$0xff] }
 0x1d1   :  { %545 = vmax.xlane.f32.xlu1 %v1521_v62  ;;  %770 = vmatpush.msra.mxu3 %v579_v11  ;;  %v590_v11 = vld [vmem:[#allocation5 + $0xb0] sm:$0xff] }
 0x1d2   :  { %730 = vmatpush.msra.mxu1 %v577_v9  ;;  %711 = vmatpush.msra.mxu0 %v568_v12  ;;  %v588_v9 = vld [vmem:[#allocation5 + $0xa0] sm:$0xff]  ;;  %v591_v12 = vld [vmem:[#allocation5 + $0xb8] sm:$0xff] }
 0x1d3   :  { %771 = vmatpush.msra.mxu3 %v571_v15  ;;  %v582_v15 = vld [vmem:[#allocation5 + $0x70] sm:$0xff] }
 0x1d4   :  { %731 = vmatpush.msra.mxu1 %v569_v13  ;;  %776 = vmatpush.msrb.mxu0 %v692_v16  ;;  %v580_v13 = vld [vmem:[#allocation5 + $0x60] sm:$0xff]  ;;  %v583_v16 = vld [vmem:[#allocation5 + $0x78] sm:$0xff] }
 0x1d5   :  { %836 = vmatpush.msrb.mxu3 %v695_v19  ;;  %v574_v19 = vld [vmem:[#allocation5 + $0x30] sm:$0xff] }
 0x1d6   :  { %796 = vmatpush.msrb.mxu1 %v693_v17  ;;  %777 = vmatpush.msrb.mxu0 %v684_v20  ;;  %v572_v17 = vld [vmem:[#allocation5 + $0x20] sm:$0xff]  ;;  %v575_v20 = vld [vmem:[#allocation5 + $0x38] sm:$0xff] }
 0x1d7   :  { %837 = vmatpush.msrb.mxu3 %v687_v23 }
 0x1d8   :  { %797 = vmatpush.msrb.mxu1 %v685_v21  ;;  %778 = vmatpush.msrb.mxu0 %v676_v24 }
 0x1d9   :  { %838 = vmatpush.msrb.mxu3 %v679_v27 }
 0x1da   :  { %798 = vmatpush.msrb.mxu1 %v677_v25  ;;  %779 = vmatpush.msrb.mxu0 %v668_v28 }
 0x1dc   :  { %799 = vmatpush.msrb.mxu1 %v669_v29  ;;  %780 = vmatpush.msrb.mxu0 %v660_v1 }
 0x1de   :  { %800 = vmatpush.msrb.mxu1 %v661_v2  ;;  %781 = vmatpush.msrb.mxu0 %v652_v32 }
 0x1e0   :  { %801 = vmatpush.msrb.mxu1 %v653_v33  ;;  %782 = vmatpush.msrb.mxu0 %v644_v36 }
 0x1e2   :  { %802 = vmatpush.msrb.mxu1 %v645_v37  ;;  %783 = vmatpush.msrb.mxu0 %v636_v40 }
 0x1e4   :  { %803 = vmatpush.msrb.mxu1 %v637_v4  ;;  %784 = vmatpush.msrb.mxu0 %v628_v42  ;;  %v1171_v4 = vld [vmem:[#allocation2 + $0x78] sm:$0xff] }
 0x1e5   :  { %v1174_v42 = vld [vmem:[#allocation2 + $0x1f8] sm:$0xff] }
 0x1e6   :  { %804 = vmatpush.msrb.mxu1 %v629_v7  ;;  %v1175_v7 = vld [vmem:[#allocation2 + $0x70] sm:$0xff] }
 0x1e8   :  { %805 = vmatpush.msrb.mxu1 %v621_v45  ;;  %v1181_v45 = vld [vmem:[#allocation2 + $0x168] sm:$0xff] }
 0x1ea   :  { %806 = vmatpush.msrb.mxu1 %v613_v50  ;;  %v1185_v50 = vld [vmem:[#allocation2 + $0x160] sm:$0xff] }
 0x1ec   :  { %807 = vmatpush.msrb.mxu1 %v605_v57  ;;  %v1189_v57 = vld [vmem:[#allocation2 + $0x158] sm:$0xff] }
 0x23a   :  { %v519_v0 = vpop.xlane.xlu1 %518 }
 0x23b   :  { %v1525_v3 = vsub.f32 %v1517_v54, %v519_v0  ;;  %v671_v0 = vld [vmem:[#allocation5 + $0x338] sm:$0xff] }
 0x23c   :  { %839 = vmatpush.msrb.mxu3 %v671_v0 }
 0x23d   :  { %v521_v34 = vmul.f32 1.442695, %v1525_v3 }
 0x23e   :  { %840 = vmatpush.msrb.mxu3 %v663_v31 }
 0x23f   :  { %1151 = vpow2.f32 %v521_v34  ;;  %v654_v34 = vld [vmem:[#allocation5 + $0x2b0] sm:$0xff] }
 0x240   :  { %841 = vmatpush.msrb.mxu3 %v655_v35 }
 0x242   :  { %842 = vmatpush.msrb.mxu3 %v647_v39 }
 0x244   :  { %v546_v44 = vpop.xlane.xlu1 %545  ;;  %843 = vmatpush.msrb.mxu3 %v639_v5  ;;  %v1173_v5 = vld [vmem:[#allocation2 + $0x178] sm:$0xff] }
 0x245   :  { %v1528_v47 = vpop.eup %1151  ;;  %v547_v48 = vsub.f32 %v1521_v62, %v546_v44  ;;  %v586_v62 = vld [vmem:[#allocation5 + $0x90] sm:$0xff]  ;;  %v620_v44 = vld [vmem:[#allocation5 + $0x1a0] sm:$0xff] }
 0x246   :  { %523 = vadd.xlane.f32.xlu2 %v1528_v47  ;;  %749 = vmatpush.msra.mxu2 %v586_v62  ;;  %v597_v62 = vld [vmem:[#allocation5 + $0xe8] sm:$0xff] }
 0x247   :  { %v548_v52 = vmul.f32 1.442695, %v547_v48  ;;  %844 = vmatpush.msrb.mxu3 %v631_v8  ;;  %v623_v48 = vld [vmem:[#allocation5 + $0x1b8] sm:$0xff]  ;;  %785 = vmatpush.msrb.mxu0 %v620_v44  ;;  %v1179_v8 = vld [vmem:[#allocation2 + $0x68] sm:$0xff] }
 0x248   :  { %750 = vmatpush.msra.mxu2 %v578_v10  ;;  %808 = vmatpush.msrb.mxu1 %v597_v62  ;;  %v589_v10 = vld [vmem:[#allocation5 + $0xa8] sm:$0xff]  ;;  %v1193_v62 = vld [vmem:[#allocation2 + $0x150] sm:$0xff] }
 0x249   :  { %1153 = vpow2.f32 %v548_v52  ;;  %845 = vmatpush.msrb.mxu3 %v623_v48  ;;  %v615_v52 = vld [vmem:[#allocation5 + $0x178] sm:$0xff]  ;;  %786 = vmatpush.msrb.mxu0 %v612_v49  ;;  %v1180_v44 = vld [vmem:[#allocation2 + $0xe8] sm:$0xff]  ;;  %v1183_v48 = vld [vmem:[#allocation2 + $0x60] sm:$0xff] }
 0x24a   :  { %751 = vmatpush.msra.mxu2 %v570_v14  ;;  %809 = vmatpush.msrb.mxu1 %v589_v10  ;;  %v581_v14 = vld [vmem:[#allocation5 + $0x68] sm:$0xff]  ;;  %v1184_v49 = vld [vmem:[#allocation2 + $0xe0] sm:$0xff] }
 0x24b   :  { %846 = vmatpush.msrb.mxu3 %v615_v52  ;;  %787 = vmatpush.msrb.mxu0 %v604_v56  ;;  %v1187_v52 = vld [vmem:[#allocation2 + $0x58] sm:$0xff]  ;;  %v1197_v10 = vld [vmem:[#allocation2 + $0x148] sm:$0xff] }
 0x24c   :  { %816 = vmatpush.msrb.mxu2 %v694_v18  ;;  %v573_v18 = vld [vmem:[#allocation5 + $0x28] sm:$0xff]  ;;  %810 = vmatpush.msrb.mxu1 %v581_v14  ;;  %v1188_v56 = vld [vmem:[#allocation2 + $0xd8] sm:$0xff]  ;;  %v1201_v14 = vld [vmem:[#allocation2 + $0x140] sm:$0xff] }
 0x24d   :  { %847 = vmatpush.msrb.mxu3 %v607_v59  ;;  %788 = vmatpush.msrb.mxu0 %v596_v61  ;;  %v1191_v59 = vld [vmem:[#allocation2 + $0x50] sm:$0xff] }
 0x24e   :  { %817 = vmatpush.msrb.mxu2 %v686_v22  ;;  %811 = vmatpush.msrb.mxu1 %v573_v18  ;;  %v1192_v61 = vld [vmem:[#allocation2 + $0xd0] sm:$0xff]  ;;  %v1205_v18 = vld [vmem:[#allocation2 + $0x138] sm:$0xff] }
 0x24f   :  { %v1532_v55 = vpop.eup %1153  ;;  %848 = vmatpush.msrb.mxu3 %v599_v6  ;;  %789 = vmatpush.msrb.mxu0 %v588_v9  ;;  %v1195_v6 = vld [vmem:[#allocation2 + $0x48] sm:$0xff] }
 0x250   :  { %550 = vadd.xlane.f32.xlu2 %v1532_v55  ;;  %818 = vmatpush.msrb.mxu2 %v678_v26  ;;  %v1196_v9 = vld [vmem:[#allocation2 + $0xc8] sm:$0xff] }
 0x251   :  { %849 = vmatpush.msrb.mxu3 %v591_v12  ;;  %790 = vmatpush.msrb.mxu0 %v580_v13  ;;  %v1199_v12 = vld [vmem:[#allocation2 + $0x40] sm:$0xff] }
 0x252   :  { %819 = vmatpush.msrb.mxu2 %v670_v53  ;;  %v1200_v13 = vld [vmem:[#allocation2 + $0xc0] sm:$0xff] }
 0x253   :  { %850 = vmatpush.msrb.mxu3 %v583_v16  ;;  %791 = vmatpush.msrb.mxu0 %v572_v17  ;;  %v1203_v16 = vld [vmem:[#allocation2 + $0x38] sm:$0xff] }
 0x254   :  { %820 = vmatpush.msrb.mxu2 %v662_v30  ;;  %v1204_v17 = vld [vmem:[#allocation2 + $0xb8] sm:$0xff] }
 0x255   :  { %851 = vmatpush.msrb.mxu3 %v575_v20  ;;  %v1207_v20 = vld [vmem:[#allocation2 + $0x30] sm:$0xff] }
 0x256   :  { %821 = vmatpush.msrb.mxu2 %v654_v34 }
 0x258   :  { %822 = vmatpush.msrb.mxu2 %v646_v38 }
 0x25a   :  { %823 = vmatpush.msrb.mxu2 %v638_v41  ;;  %v1172_v41 = vld [vmem:[#allocation2 + $0xf8] sm:$0xff] }
 0x25c   :  { %824 = vmatpush.msrb.mxu2 %v630_v43  ;;  %v1176_v43 = vld [vmem:[#allocation2 + $0xf0] sm:$0xff] }
 0x25e   :  { %825 = vmatpush.msrb.mxu2 %v622_v46  ;;  %v1182_v46 = vld [vmem:[#allocation2 + $0x1e8] sm:$0xff] }
 0x260   :  { %826 = vmatpush.msrb.mxu2 %v614_v51  ;;  %v1186_v51 = vld [vmem:[#allocation2 + $0x1e0] sm:$0xff] }
 0x262   :  { %827 = vmatpush.msrb.mxu2 %v606_v58  ;;  %v1190_v58 = vld [vmem:[#allocation2 + $0x1d8] sm:$0xff] }
 0x264   :  { %828 = vmatpush.msrb.mxu2 %v598_v63  ;;  %v1194_v63 = vld [vmem:[#allocation2 + $0x1d0] sm:$0xff] }
 0x266   :  { %829 = vmatpush.msrb.mxu2 %v590_v11  ;;  %v1198_v11 = vld [vmem:[#allocation2 + $0x1c8] sm:$0xff] }
 0x268   :  { %830 = vmatpush.msrb.mxu2 %v582_v15  ;;  %v1202_v15 = vld [vmem:[#allocation2 + $0x1c0] sm:$0xff] }
 0x26a   :  { %831 = vmatpush.msrb.mxu2 %v574_v19  ;;  %v1206_v19 = vld [vmem:[#allocation2 + $0x1b8] sm:$0xff] }
 0x2b9   :  { %v1535_v60 = vpop.xlane.xlu2 %523 }
 0x2ba   :  { %1155 = vrcp.f32 %v1535_v60  ;;  %v536_v29 = vand.u32 2147483648, %v1535_v60  ;;  %vm530_vm4 = vweird.f32 %v1535_v60  ;;  %v534_v53 = vand.u32 2147483647, %v1535_v60 }
 0x2bc   :  { %v537_v32 = vor.u32 1.1754944e-38, %v536_v29  ;;  %vm535_vm7 = vcmp.eq.f32.partialorder %v534_v53, 8.507059e+37  ;;  %v1216_v29 = vld [vmem:[#allocation2 + $0xa0] sm:$0xff] }
 0x2bd   :  { %v1217_v53 = vld [vmem:[#allocation2 + $0x120] sm:$0xff] }
 0x2c0   :  { %v1156_v21 = vpop.eup %1155 }
 0x2c1   :  { %v526_v22 = vmul.f32 %v1156_v21, %v1535_v60  ;;  %vm531_vm3 = vweird.f32 %v1156_v21 }
 0x2c2   :  { %vm532_vm5 = vmor %vm530_vm4, %vm531_vm3  ;;  %vm1119_vm3 = vcmask 0  }
 0x2c3   :  { %v527_v23 = vsub.f32 1.0, %v526_v22  ;;  %v551_v24 = vpop.xlane.xlu2 %550  ;;  %v1209_v22 = vld [vmem:[#allocation2 + $0x130] sm:$0xff] }
 0x2c4   :  { %1157 = vrcp.f32 %v551_v24  ;;  %v563_v1 = vand.u32 2147483648, %v551_v24  ;;  %v561_v31 = vand.u32 2147483647, %v551_v24  ;;  %vm557_vm8 = vweird.f32 %v551_v24 }
 0x2c5   :  { %v528_v25 = vmul.f32 %v1156_v21, %v527_v23  ;;  %v1210_v23 = vld [vmem:[#allocation2 + $0x1b0] sm:$0xff] }
 0x2c6   :  { %v564_v35 = vor.u32 1.1754944e-38, %v563_v1  ;;  %vm562_vm10 = vcmp.eq.f32.partialorder %v561_v31, 8.507059e+37  ;;  %v1219_v1 = vld [vmem:[#allocation2 + $0x18] sm:$0xff] }
 0x2c7   :  { %v529_v27 = vadd.f32 %v1156_v21, %v528_v25  ;;  %v1212_v25 = vld [vmem:[#allocation2 + $0xa8] sm:$0xff]  ;;  %v1222_v31 = vld [vmem:[#allocation2 + $0x198] sm:$0xff] }
 0x2c9   :  { %v533_v2 = vsel %vm532_vm5, %v1156_v21, %v529_v27  ;;  %v1208_v21 = vld [vmem:[#allocation2 + $0xb0] sm:$0xff]  ;;  %v1214_v27 = vld [vmem:[#allocation2 + $0x1a8] sm:$0xff] }
 0x2ca   :  { %v1158_v26 = vpop.eup %1157  ;;  %v538_v34 = vsel %vm535_vm7, %v537_v32, %v533_v2  ;;  %v1220_v2 = vld [vmem:[#allocation2 + $0x98] sm:$0xff]  ;;  %v1223_v32 = vld [vmem:[#allocation2 + $0x10] sm:$0xff] }
 0x2cb   :  { %v553_v28 = vmul.f32 %v1158_v26, %v551_v24  ;;  %vm558_vm6 = vweird.f32 %v1158_v26  ;;  %v539_v38 = vmul.f32 %v1528_v47, %v538_v34  ;;  %v1177_v47 = vld [vmem:[#allocation2 + $0x170] sm:$0xff]  ;;  %v1211_v24 = vld [vmem:[#allocation2 + $0x28] sm:$0xff] }
 0x2cc   :  { %vm559_vm9 = vmor %vm557_vm8, %vm558_vm6  ;;  %v1225_v34 = vld [vmem:[#allocation2 + $0x110] sm:$0xff] }
 0x2cd   :  { %v554_v0 = vsub.f32 1.0, %v553_v28  ;;  %v1215_v28 = vld [vmem:[#allocation2 + $0x20] sm:$0xff] }
 0x2cf   :  { %v555_v30 = vmul.f32 %v1158_v26, %v554_v0  ;;  %v1218_v0 = vld [vmem:[#allocation2 + $0x1a0] sm:$0xff] }
 0x2d1   :  { %v556_v33 = vadd.f32 %v1158_v26, %v555_v30  ;;  %v1221_v30 = vld [vmem:[#allocation2 + $0x118] sm:$0xff] }
 0x2d3   :  { %v560_v36 = vsel %vm559_vm9, %v1158_v26, %v556_v33  ;;  %v1213_v26 = vld [vmem:[#allocation2 + $0x128] sm:$0xff]  ;;  %v1224_v33 = vld [vmem:[#allocation2 + $0x90] sm:$0xff] }
 0x2d4   :  { %v565_v37 = vsel %vm562_vm10, %v564_v35, %v560_v36  ;;  %v1226_v35 = vld [vmem:[#allocation2 + $0x190] sm:$0xff]  ;;  %v1227_v36 = vld [vmem:[#allocation2 + $0x8] sm:$0xff] }
 0x2d5   :  { %v566_v39 = vmul.f32 %v1532_v55, %v565_v37  ;;  %v1178_v55 = vld [vmem:[#allocation2 + $0x1f0] sm:$0xff]  ;;  %v1228_v37 = vld [vmem:[#allocation2 + $0x88] sm:$0xff] }
 0x2d7   :  { %v567_v40 = vsub.f32 %v566_v39, %v539_v38  ;;  %v1229_v38 = vld [vmem:[#allocation2 + $0x108] sm:$0xff] }
 0x2d8   :  { %v1230_v39 = vld [vmem:[#allocation2 + $0x188] sm:$0xff] }
 0x2d9   :  { %712 = vmatmul.f32.vlgmr.msra.gmra.mxu0 %v567_v40  ;;  %732 = vmatmul.f32.vlgmr.msra.gmra.mxu1 %v567_v40 }
 0x2da   :  { %752 = vmatmul.f32.vlgmr.msra.gmra.mxu2 %v567_v40  ;;  %772 = vmatmul.f32.vlgmr.msra.gmra.mxu3 %v567_v40 }
 0x2db   :  { %919 = vmatpush.msra.mxu0 %v1171_v4  ;;  %939 = vmatpush.msra.mxu1 %v1172_v41  ;;  %v1232_v4 = vld [vmem:[#allocation2 + $0x80] sm:$0xff] }
 0x2dc   :  { %959 = vmatpush.msra.mxu2 %v1173_v5  ;;  %979 = vmatpush.msra.mxu3 %v1174_v42  ;;  %v1233_v41 = vld [vmem:[#allocation2 + $0x100] sm:$0xff]  ;;  %v1235_v42 = vld [vmem:[#allocation2 + $0x278] sm:$0xff] }
 0x2dd   :  { %920 = vmatpush.msra.mxu0 %v1175_v7  ;;  %940 = vmatpush.msra.mxu1 %v1176_v43  ;;  %v1234_v5 = vld [vmem:[#allocation2 + $0x180] sm:$0xff]  ;;  %v1236_v7 = vld [vmem:[#allocation2 + $0x2f8] sm:$0xff] }
 0x2de   :  { %960 = vmatpush.msra.mxu2 %v1177_v47  ;;  %980 = vmatpush.msra.mxu3 %v1178_v55  ;;  %v1237_v43 = vld [vmem:[#allocation2 + $0x378] sm:$0xff]  ;;  %v1239_v55 = vld [vmem:[#allocation2 + $0x270] sm:$0xff] }
 0x2df   :  { %921 = vmatpush.msra.mxu0 %v1179_v8  ;;  %941 = vmatpush.msra.mxu1 %v1180_v44  ;;  %v1238_v47 = vld [vmem:[#allocation2 + $0x3f8] sm:$0xff]  ;;  %v1240_v8 = vld [vmem:[#allocation2 + $0x2f0] sm:$0xff] }
 0x2e0   :  { %961 = vmatpush.msra.mxu2 %v1181_v45  ;;  %981 = vmatpush.msra.mxu3 %v1182_v46  ;;  %v1241_v44 = vld [vmem:[#allocation2 + $0x370] sm:$0xff]  ;;  %v1243_v46 = vld [vmem:[#allocation2 + $0x268] sm:$0xff] }
 0x2e1   :  { %792 = vmatmul.f32.vlgmr.msrb.gmra.mxu0 %v567_v40  ;;  %812 = vmatmul.f32.vlgmr.msrb.gmra.mxu1 %v567_v40  ;;  %v1242_v45 = vld [vmem:[#allocation2 + $0x3f0] sm:$0xff] }
 0x2e2   :  { %832 = vmatmul.f32.vlgmr.msrb.gmra.mxu2 %v567_v40  ;;  %852 = vmatmul.f32.vlgmr.msrb.gmra.mxu3 %v567_v40  ;;  %v1231_v40 = vld [vmem:[#allocation2] sm:$0xff] }
 0x2e3   :  { %922 = vmatpush.msra.mxu0 %v1183_v48  ;;  %942 = vmatpush.msra.mxu1 %v1184_v49  ;;  %v1244_v48 = vld [vmem:[#allocation2 + $0x2e8] sm:$0xff] }
 0x2e4   :  { %962 = vmatpush.msra.mxu2 %v1185_v50  ;;  %982 = vmatpush.msra.mxu3 %v1186_v51  ;;  %v1245_v49 = vld [vmem:[#allocation2 + $0x368] sm:$0xff]  ;;  %v1247_v51 = vld [vmem:[#allocation2 + $0x260] sm:$0xff] }
 0x2e5   :  { %923 = vmatpush.msra.mxu0 %v1187_v52  ;;  %943 = vmatpush.msra.mxu1 %v1188_v56  ;;  %v1246_v50 = vld [vmem:[#allocation2 + $0x3e8] sm:$0xff]  ;;  %v1248_v52 = vld [vmem:[#allocation2 + $0x2e0] sm:$0xff] }
 0x2e6   :  { %963 = vmatpush.msra.mxu2 %v1189_v57  ;;  %983 = vmatpush.msra.mxu3 %v1190_v58  ;;  %v1249_v56 = vld [vmem:[#allocation2 + $0x360] sm:$0xff]  ;;  %v1251_v58 = vld [vmem:[#allocation2 + $0x258] sm:$0xff] }
 0x2e7   :  { %924 = vmatpush.msra.mxu0 %v1191_v59  ;;  %944 = vmatpush.msra.mxu1 %v1192_v61  ;;  %v1250_v57 = vld [vmem:[#allocation2 + $0x3e0] sm:$0xff]  ;;  %v1252_v59 = vld [vmem:[#allocation2 + $0x2d8] sm:$0xff] }
 0x2e8   :  { %964 = vmatpush.msra.mxu2 %v1193_v62  ;;  %984 = vmatpush.msra.mxu3 %v1194_v63  ;;  %v1253_v61 = vld [vmem:[#allocation2 + $0x358] sm:$0xff]  ;;  %v1255_v63 = vld [vmem:[#allocation2 + $0x250] sm:$0xff] }
 0x2e9   :  { %925 = vmatpush.msra.mxu0 %v1195_v6  ;;  %945 = vmatpush.msra.mxu1 %v1196_v9  ;;  %v1254_v62 = vld [vmem:[#allocation2 + $0x3d8] sm:$0xff]  ;;  %v1256_v6 = vld [vmem:[#allocation2 + $0x2d0] sm:$0xff] }
 0x2ea   :  { %965 = vmatpush.msra.mxu2 %v1197_v10  ;;  %985 = vmatpush.msra.mxu3 %v1198_v11  ;;  %v1257_v9 = vld [vmem:[#allocation2 + $0x350] sm:$0xff]  ;;  %v1259_v11 = vld [vmem:[#allocation2 + $0x248] sm:$0xff] }
 0x2eb   :  { %926 = vmatpush.msra.mxu0 %v1199_v12  ;;  %946 = vmatpush.msra.mxu1 %v1200_v13  ;;  %v1258_v10 = vld [vmem:[#allocation2 + $0x3d0] sm:$0xff]  ;;  %v1260_v12 = vld [vmem:[#allocation2 + $0x2c8] sm:$0xff] }
 0x2ec   :  { %966 = vmatpush.msra.mxu2 %v1201_v14  ;;  %986 = vmatpush.msra.mxu3 %v1202_v15  ;;  %v1261_v13 = vld [vmem:[#allocation2 + $0x348] sm:$0xff]  ;;  %v1263_v15 = vld [vmem:[#allocation2 + $0x240] sm:$0xff] }
 0x2ed   :  { %927 = vmatpush.msra.mxu0 %v1203_v16  ;;  %947 = vmatpush.msra.mxu1 %v1204_v17  ;;  %v1262_v14 = vld [vmem:[#allocation2 + $0x3c8] sm:$0xff]  ;;  %v1264_v16 = vld [vmem:[#allocation2 + $0x2c0] sm:$0xff] }
 0x2ee   :  { %967 = vmatpush.msra.mxu2 %v1205_v18  ;;  %987 = vmatpush.msra.mxu3 %v1206_v19  ;;  %v1265_v17 = vld [vmem:[#allocation2 + $0x340] sm:$0xff]  ;;  %v1267_v19 = vld [vmem:[#allocation2 + $0x238] sm:$0xff] }
 0x2ef   :  { %928 = vmatpush.msra.mxu0 %v1207_v20  ;;  %948 = vmatpush.msra.mxu1 %v1208_v21  ;;  %v1266_v18 = vld [vmem:[#allocation2 + $0x3c0] sm:$0xff]  ;;  %v1268_v20 = vld [vmem:[#allocation2 + $0x2b8] sm:$0xff] }
 0x2f0   :  { %968 = vmatpush.msra.mxu2 %v1209_v22  ;;  %988 = vmatpush.msra.mxu3 %v1210_v23  ;;  %v1269_v21 = vld [vmem:[#allocation2 + $0x338] sm:$0xff]  ;;  %v1271_v23 = vld [vmem:[#allocation2 + $0x230] sm:$0xff] }
 0x2f1   :  { %929 = vmatpush.msra.mxu0 %v1211_v24  ;;  %949 = vmatpush.msra.mxu1 %v1212_v25  ;;  %v1270_v22 = vld [vmem:[#allocation2 + $0x3b8] sm:$0xff]  ;;  %v1272_v24 = vld [vmem:[#allocation2 + $0x2b0] sm:$0xff] }
 0x2f2   :  { %969 = vmatpush.msra.mxu2 %v1213_v26  ;;  %989 = vmatpush.msra.mxu3 %v1214_v27  ;;  %v1273_v25 = vld [vmem:[#allocation2 + $0x330] sm:$0xff]  ;;  %v1275_v27 = vld [vmem:[#allocation2 + $0x228] sm:$0xff] }
 0x2f3   :  { %930 = vmatpush.msra.mxu0 %v1215_v28  ;;  %950 = vmatpush.msra.mxu1 %v1216_v29  ;;  %v1274_v26 = vld [vmem:[#allocation2 + $0x3b0] sm:$0xff]  ;;  %v1276_v28 = vld [vmem:[#allocation2 + $0x2a8] sm:$0xff] }
 0x2f4   :  { %970 = vmatpush.msra.mxu2 %v1217_v53  ;;  %990 = vmatpush.msra.mxu3 %v1218_v0  ;;  %v1277_v29 = vld [vmem:[#allocation2 + $0x328] sm:$0xff]  ;;  %v1279_v0 = vld [vmem:[#allocation2 + $0x220] sm:$0xff] }
 0x2f5   :  { %931 = vmatpush.msra.mxu0 %v1219_v1  ;;  %951 = vmatpush.msra.mxu1 %v1220_v2  ;;  %v1278_v53 = vld [vmem:[#allocation2 + $0x3a8] sm:$0xff]  ;;  %v1280_v1 = vld [vmem:[#allocation2 + $0x2a0] sm:$0xff] }
 0x2f6   :  { %971 = vmatpush.msra.mxu2 %v1221_v30  ;;  %991 = vmatpush.msra.mxu3 %v1222_v31  ;;  %v1281_v2 = vld [vmem:[#allocation2 + $0x320] sm:$0xff]  ;;  %v1283_v31 = vld [vmem:[#allocation2 + $0x218] sm:$0xff] }
 0x2f7   :  { %932 = vmatpush.msra.mxu0 %v1223_v32  ;;  %952 = vmatpush.msra.mxu1 %v1224_v33  ;;  %v1282_v30 = vld [vmem:[#allocation2 + $0x3a0] sm:$0xff]  ;;  %v1284_v32 = vld [vmem:[#allocation2 + $0x298] sm:$0xff] }
 0x2f8   :  { %972 = vmatpush.msra.mxu2 %v1225_v34  ;;  %992 = vmatpush.msra.mxu3 %v1226_v35  ;;  %v1285_v33 = vld [vmem:[#allocation2 + $0x318] sm:$0xff]  ;;  %v1287_v35 = vld [vmem:[#allocation2 + $0x210] sm:$0xff] }
 0x2f9   :  { %933 = vmatpush.msra.mxu0 %v1227_v36  ;;  %953 = vmatpush.msra.mxu1 %v1228_v37  ;;  %v1286_v34 = vld [vmem:[#allocation2 + $0x398] sm:$0xff]  ;;  %v1288_v36 = vld [vmem:[#allocation2 + $0x290] sm:$0xff] }
 0x2fa   :  { %973 = vmatpush.msra.mxu2 %v1229_v38  ;;  %993 = vmatpush.msra.mxu3 %v1230_v39  ;;  %v1289_v37 = vld [vmem:[#allocation2 + $0x310] sm:$0xff]  ;;  %v1291_v39 = vld [vmem:[#allocation2 + $0x208] sm:$0xff] }
 0x2fb   :  { %934 = vmatpush.msra.mxu0 %v1231_v40  ;;  %954 = vmatpush.msra.mxu1 %v1232_v4  ;;  %v1290_v38 = vld [vmem:[#allocation2 + $0x390] sm:$0xff]  ;;  %v1292_v40 = vld [vmem:[#allocation2 + $0x288] sm:$0xff] }
 0x2fc   :  { %974 = vmatpush.msra.mxu2 %v1233_v41  ;;  %994 = vmatpush.msra.mxu3 %v1234_v5  ;;  %v1293_v4 = vld [vmem:[#allocation2 + $0x308] sm:$0xff]  ;;  %v1295_v5 = vld [vmem:[#allocation2 + $0x200] sm:$0xff] }
 0x2fd   :  { %999 = vmatpush.msrb.mxu0 %v1235_v42  ;;  %1019 = vmatpush.msrb.mxu1 %v1236_v7  ;;  %v1294_v41 = vld [vmem:[#allocation2 + $0x388] sm:$0xff]  ;;  %v1296_v42 = vld [vmem:[#allocation2 + $0x280] sm:$0xff] }
 0x2fe   :  { %1039 = vmatpush.msrb.mxu2 %v1237_v43  ;;  %1059 = vmatpush.msrb.mxu3 %v1238_v47  ;;  %v1297_v7 = vld [vmem:[#allocation2 + $0x300] sm:$0xff] }
 0x2ff   :  { %1000 = vmatpush.msrb.mxu0 %v1239_v55  ;;  %1020 = vmatpush.msrb.mxu1 %v1240_v8  ;;  %v1298_v43 = vld [vmem:[#allocation2 + $0x380] sm:$0xff] }
 0x300   :  { %1040 = vmatpush.msrb.mxu2 %v1241_v44  ;;  %1060 = vmatpush.msrb.mxu3 %v1242_v45 }
 0x301   :  { %1001 = vmatpush.msrb.mxu0 %v1243_v46  ;;  %1021 = vmatpush.msrb.mxu1 %v1244_v48 }
 0x302   :  { %1041 = vmatpush.msrb.mxu2 %v1245_v49  ;;  %1061 = vmatpush.msrb.mxu3 %v1246_v50 }
 0x303   :  { %1002 = vmatpush.msrb.mxu0 %v1247_v51  ;;  %1022 = vmatpush.msrb.mxu1 %v1248_v52 }
 0x304   :  { %1042 = vmatpush.msrb.mxu2 %v1249_v56  ;;  %1062 = vmatpush.msrb.mxu3 %v1250_v57 }
 0x305   :  { %1003 = vmatpush.msrb.mxu0 %v1251_v58  ;;  %1023 = vmatpush.msrb.mxu1 %v1252_v59 }
 0x306   :  { %1043 = vmatpush.msrb.mxu2 %v1253_v61  ;;  %1063 = vmatpush.msrb.mxu3 %v1254_v62 }
 0x307   :  { %1004 = vmatpush.msrb.mxu0 %v1255_v63  ;;  %1024 = vmatpush.msrb.mxu1 %v1256_v6 }
 0x308   :  { %1044 = vmatpush.msrb.mxu2 %v1257_v9  ;;  %1064 = vmatpush.msrb.mxu3 %v1258_v10 }
 0x309   :  { %1005 = vmatpush.msrb.mxu0 %v1259_v11  ;;  %1025 = vmatpush.msrb.mxu1 %v1260_v12 }
 0x30a   :  { %1045 = vmatpush.msrb.mxu2 %v1261_v13  ;;  %1065 = vmatpush.msrb.mxu3 %v1262_v14 }
 0x30b   :  { %1006 = vmatpush.msrb.mxu0 %v1263_v15  ;;  %1026 = vmatpush.msrb.mxu1 %v1264_v16 }
 0x30c   :  { %1046 = vmatpush.msrb.mxu2 %v1265_v17  ;;  %1066 = vmatpush.msrb.mxu3 %v1266_v18 }
 0x30d   :  { %1007 = vmatpush.msrb.mxu0 %v1267_v19  ;;  %1027 = vmatpush.msrb.mxu1 %v1268_v20 }
 0x30e   :  { %1047 = vmatpush.msrb.mxu2 %v1269_v21  ;;  %1067 = vmatpush.msrb.mxu3 %v1270_v22 }
 0x30f   :  { %1008 = vmatpush.msrb.mxu0 %v1271_v23  ;;  %1028 = vmatpush.msrb.mxu1 %v1272_v24 }
 0x310   :  { %1048 = vmatpush.msrb.mxu2 %v1273_v25  ;;  %1068 = vmatpush.msrb.mxu3 %v1274_v26 }
 0x311   :  { %1009 = vmatpush.msrb.mxu0 %v1275_v27  ;;  %1029 = vmatpush.msrb.mxu1 %v1276_v28 }
 0x312   :  { %1049 = vmatpush.msrb.mxu2 %v1277_v29  ;;  %1069 = vmatpush.msrb.mxu3 %v1278_v53 }
 0x313   :  { %1010 = vmatpush.msrb.mxu0 %v1279_v0  ;;  %1030 = vmatpush.msrb.mxu1 %v1280_v1 }
 0x314   :  { %1050 = vmatpush.msrb.mxu2 %v1281_v2  ;;  %1070 = vmatpush.msrb.mxu3 %v1282_v30 }
 0x315   :  { %1011 = vmatpush.msrb.mxu0 %v1283_v31  ;;  %1031 = vmatpush.msrb.mxu1 %v1284_v32 }
 0x316   :  { %1051 = vmatpush.msrb.mxu2 %v1285_v33  ;;  %1071 = vmatpush.msrb.mxu3 %v1286_v34 }
 0x317   :  { %1012 = vmatpush.msrb.mxu0 %v1287_v35  ;;  %1032 = vmatpush.msrb.mxu1 %v1288_v36 }
 0x318   :  { %1052 = vmatpush.msrb.mxu2 %v1289_v37  ;;  %1072 = vmatpush.msrb.mxu3 %v1290_v38 }
 0x319   :  { %1013 = vmatpush.msrb.mxu0 %v1291_v39  ;;  %1033 = vmatpush.msrb.mxu1 %v1292_v40 }
 0x31a   :  { %1053 = vmatpush.msrb.mxu2 %v1293_v4  ;;  %1073 = vmatpush.msrb.mxu3 %v1294_v41 }
 0x31b   :  { %1014 = vmatpush.msrb.mxu0 %v1295_v5  ;;  %1034 = vmatpush.msrb.mxu1 %v1296_v42 }
 0x31c   :  { %1054 = vmatpush.msrb.mxu2 %v1297_v7  ;;  %1074 = vmatpush.msrb.mxu3 %v1298_v43 }
 0x356   :  { %v713_v47 = vpop.f32.mrf.mxu0  ;;  %v733_v55 = vpop.f32.mrf.mxu1 }
 0x357   :  { %v856_v50 = vand.u32 2147483647, %v713_v47  ;;  %v857_v51 = vand.u32 2147483647, %v733_v55 }
 0x35d   :  { %v753_v8 = vpop.f32.mrf.mxu2  ;;  %v773_v44 = vpop.f32.mrf.mxu3 }
 0x35e   :  { %v793_v45 = vpop.f32.mrf.mxu0  ;;  %v813_v46 = vpop.f32.mrf.mxu1  ;;  %v858_v52 = vand.u32 2147483647, %v753_v8  ;;  %v859_v56 = vand.u32 2147483647, %v773_v44 }
 0x35f   :  { %v860_v48 = vand.u32 2147483647, %v793_v45  ;;  %v861_v49 = vand.u32 2147483647, %v813_v46 }
 0x361   :  { %v864_v59 = vmax.f32 %v856_v50, %v860_v48  ;;  %v865_v61 = vmax.f32 %v857_v51, %v861_v49 }
 0x363   :  { %v868_v10 = vmax.f32 %v864_v59, %v865_v61 }
 0x365   :  { %v833_v57 = vpop.f32.mrf.mxu2  ;;  %v853_v58 = vpop.f32.mrf.mxu3 }
 0x366   :  { %v862_v62 = vand.u32 2147483647, %v833_v57  ;;  %v863_v63 = vand.u32 2147483647, %v853_v58 }
 0x368   :  { %v866_v6 = vmax.f32 %v858_v52, %v862_v62  ;;  %v867_v9 = vmax.f32 %v859_v56, %v863_v63 }
 0x36a   :  { %v869_v11 = vmax.f32 %v866_v6, %v867_v9 }
 0x36c   :  { %v870_v12 = vmax.f32 %v868_v10, %v869_v11 }
 0x36e   :  { %871 = vmax.xlane.f32.xlu0 %v870_v12 }
 0x3e1   :  { %v872_v13 = vpop.xlane.xlu0 %871 }
 0x3e2   :  { %v873_v14 = vadd.f32 1e-12, %v872_v13 }
 0x3e4   :  { %1159 = vrcp.f32 %v873_v14 }
 0x3ea   :  { %v1160_v15 = vpop.eup %1159 }
 0x3eb   :  { %v875_v16 = vmul.f32 %v1160_v15, %v713_v47  ;;  %v876_v17 = vmul.f32 %v1160_v15, %v733_v55  ;;  %v877_v18 = vmul.f32 %v1160_v15, %v753_v8  ;;  %v878_v19 = vmul.f32 %v1160_v15, %v773_v44 }
 0x3ec   :  { %v879_v22 = vmul.f32 %v1160_v15, %v793_v45  ;;  %v880_v25 = vmul.f32 %v1160_v15, %v813_v46  ;;  %v881_v28 = vmul.f32 %v1160_v15, %v833_v57  ;;  %v882_v0 = vmul.f32 %v1160_v15, %v853_v58 }
 0x3ed   :  { %v883_v20 = vmul.f32 %v875_v16, %v875_v16  ;;  %v884_v21 = vmul.f32 %v876_v17, %v876_v17  ;;  %v885_v23 = vmul.f32 %v877_v18, %v877_v18  ;;  %v886_v26 = vmul.f32 %v878_v19, %v878_v19 }
 0x3ee   :  { %v887_v29 = vmul.f32 %v879_v22, %v879_v22  ;;  %v888_v1 = vmul.f32 %v880_v25, %v880_v25  ;;  %v889_v30 = vmul.f32 %v881_v28, %v881_v28  ;;  %v890_v32 = vmul.f32 %v882_v0, %v882_v0 }
 0x3ef   :  { %v891_v24 = vadd.f32 %v884_v21, %v883_v20 }
 0x3f1   :  { %v892_v27 = vadd.f32 %v891_v24, %v885_v23 }
 0x3f3   :  { %v893_v53 = vadd.f32 %v892_v27, %v886_v26 }
 0x3f5   :  { %v894_v2 = vadd.f32 %v893_v53, %v887_v29 }
 0x3f7   :  { %v895_v31 = vadd.f32 %v894_v2, %v888_v1 }
 0x3f9   :  { %v896_v33 = vadd.f32 %v895_v31, %v889_v30  ;;  %v66_v30 = vlaneseq }
 0x3fb   :  { %v897_v34 = vadd.f32 %v896_v33, %v890_v32  ;;  %v67_v31 = vshrl.u32 %v66_v30, 7 }
 0x3fd   :  { %898 = vadd.xlane.f32.xlu1 %v897_v34  ;;  %vm1110_vm2 = vcmp.lt.s32.totalorder %v67_v31, 2 }
 0x470   :  { %v899_v35 = vpop.xlane.xlu1 %898 }
 0x471   :  { %v900_v36 = vadd.f32 1e-06, %v899_v35 }
 0x473   :  { %1161 = vrsqrt.f32 %v900_v36  ;;  %vm907_vm12 = vweird.f32 %v900_v36 }
 0x479   :  { %v1162_v37 = vpop.eup %1161 }
 0x47a   :  { %v902_v38 = vmul.f32 %v1162_v37, %v900_v36  ;;  %vm908_vm11 = vweird.f32 %v1162_v37 }
 0x47b   :  { %vm909_vm13 = vmor %vm907_vm12, %vm908_vm11 }
 0x47c   :  { %v903_v39 = vmul.f32 %v1162_v37, %v902_v38 }
 0x47e   :  { %v904_v40 = vmul.f32 0.5, %v903_v39 }
 0x480   :  { %v905_v4 = vsub.f32 1.5, %v904_v40 }
 0x482   :  { %v906_v41 = vmul.f32 %v1162_v37, %v905_v4 }
 0x484   :  { %v910_v5 = vsel %vm909_vm13, %v1162_v37, %v906_v41 }
 0x485   :  { %v911_v42 = vmul.f32 %v910_v5, %v875_v16  ;;  %v912_v7 = vmul.f32 %v910_v5, %v876_v17  ;;  %v913_v43 = vmul.f32 %v910_v5, %v877_v18  ;;  %v914_v47 = vmul.f32 %v910_v5, %v878_v19 }
 0x486   :  { %v915_v55 = vmul.f32 %v910_v5, %v879_v22  ;;  %v916_v8 = vmul.f32 %v910_v5, %v880_v25  ;;  %v917_v44 = vmul.f32 %v910_v5, %v881_v28  ;;  %v918_v45 = vmul.f32 %v910_v5, %v882_v0 }
 0x487   :  { %935 = vmatmul.f32.vlgmr.msra.gmra.mxu0 %v911_v42  ;;  %955 = vmatmul.f32.vlgmr.msra.gmra.mxu1 %v912_v7 }
 0x488   :  { %975 = vmatmul.f32.vlgmr.msra.gmra.mxu2 %v913_v43  ;;  %995 = vmatmul.f32.vlgmr.msra.gmra.mxu3 %v914_v47 }
 0x48f   :  { %1015 = vmatmul.f32.vlgmr.msrb.gmra.mxu0 %v915_v55  ;;  %1035 = vmatmul.f32.vlgmr.msrb.gmra.mxu1 %v916_v8 }
 0x490   :  { %1055 = vmatmul.f32.vlgmr.msrb.gmra.mxu2 %v917_v44  ;;  %1075 = vmatmul.f32.vlgmr.msrb.gmra.mxu3 %v918_v45 }
 0x504   :  { %v936_v46 = vpop.f32.mrf.mxu0  ;;  %v956_v48 = vpop.f32.mrf.mxu1 }
 0x505   :  { %v957_v49 = vadd.f32 %v956_v48, %v936_v46 }
 0x50b   :  { %v976_v50 = vpop.f32.mrf.mxu2  ;;  %v996_v51 = vpop.f32.mrf.mxu3 }
 0x50c   :  { %v977_v52 = vadd.f32 %v976_v50, %v957_v49  ;;  %v1016_v57 = vpop.f32.mrf.mxu0  ;;  %v1036_v59 = vpop.f32.mrf.mxu1 }
 0x50e   :  { %v997_v56 = vadd.f32 %v996_v51, %v977_v52 }
 0x510   :  { %v1017_v58 = vadd.f32 %v1016_v57, %v997_v56 }
 0x512   :  { %v1037_v61 = vadd.f32 %v1036_v59, %v1017_v58 }
 0x513   :  { %v1056_v62 = vpop.f32.mrf.mxu2  ;;  %v1076_v6 = vpop.f32.mrf.mxu3 }
 0x514   :  { %v1057_v63 = vadd.f32 %v1056_v62, %v1037_v61 }
 0x516   :  { %v1077_v9 = vadd.f32 %v1076_v6, %v1057_v63 }
 0x518   :  { %v1079_v10 = vmul.f32 8.0, %v1077_v9 }
 0x51a   :  { %v1080_v11 = vadd.f32 %v1079_v10, %v1517_v54 }
 0x51c   :  { %1081 = vmax.xlane.f32.xlu2 %v1080_v11 }
 0x58f   :  { %v1082_v12 = vpop.xlane.xlu2 %1081 }
 0x590   :  { %v1083_v13 = vsub.f32 %v1080_v11, %v1082_v12 }
 0x592   :  { %v1084_v14 = vmul.f32 1.442695, %v1083_v13 }
 0x594   :  { %1163 = vpow2.f32 %v1084_v14 }
 0x59a   :  { %v1164_v15 = vpop.eup %1163 }
 0x59b   :  { %1086 = vadd.xlane.f32.xlu0 %v1164_v15 }
 0x60e   :  { %v1087_v16 = vpop.xlane.xlu0 %1086 }
 0x60f   :  { %1165 = vrcp.f32 %v1087_v16  ;;  %v1099_v23 = vand.u32 2147483648, %v1087_v16  ;;  %v1097_v25 = vand.u32 2147483647, %v1087_v16  ;;  %vm1093_vm15 = vweird.f32 %v1087_v16 }
 0x610   :  { %1167 = vlog2.f32 %v1087_v16 }
 0x611   :  { %1169 = vlog2.f32 %v1535_v60  ;;  %v1100_v28 = vor.u32 1.1754944e-38, %v1099_v23  ;;  %vm1098_vm1 = vcmp.eq.f32.partialorder %v1097_v25, 8.507059e+37 }
 0x615   :  { %v1166_v17 = vpop.eup %1165 }
 0x616   :  { %v1168_v18 = vpop.eup %1167  ;;  %v1089_v19 = vmul.f32 %v1166_v17, %v1087_v16  ;;  %vm1094_vm14 = vweird.f32 %v1166_v17 }
 0x617   :  { %v1170_v20 = vpop.eup %1169  ;;  %v1104_v22 = vmul.f32 0.6931472, %v1168_v18  ;;  %vm1095_vm0 = vmor %vm1093_vm15, %vm1094_vm14 }
 0x618   :  { %v1090_v21 = vsub.f32 1.0, %v1089_v19  ;;  %v541_v24 = vmul.f32 0.6931472, %v1170_v20 }
 0x619   :  { %v1105_v27 = vsub.f32 %v1083_v13, %v1104_v22 }
 0x61a   :  { %v1091_v54 = vmul.f32 %v1166_v17, %v1090_v21  ;;  %v542_v29 = vsub.f32 %v1525_v3, %v541_v24 }
 0x61c   :  { %v1092_v26 = vadd.f32 %v1166_v17, %v1091_v54  ;;  %v1106_v1 = vsub.f32 %v1105_v27, %v542_v29 }
 0x61e   :  { %v1096_v53 = vsel %vm1095_vm0, %v1166_v17, %v1092_v26 }
 0x61f   :  { %v1101_v60 = vsel %vm1098_vm1, %v1100_v28, %v1096_v53 }
 0x620   :  { %v1102_v0 = vmul.f32 %v1164_v15, %v1101_v60 }
 0x622   :  { %v1107_v2 = vmul.f32 %v1106_v1, %v1102_v0 }
 0x624   :  { %1108 = vadd.xlane.f32.xlu1 %v1107_v2 }
 0x697   :  { %v1109_v32 = vpop.xlane.xlu1 %1108 }
 0x698   :  { %v1111_v33 = vsel %vm1110_vm2, %v1109_v32, 0.0 }
 0x699   :  { %v1112_v34 = vrot.slane %v1111_v33, 4 }
 0x69b   :  { %v1113_v35 = vadd.f32 %v1112_v34, %v1111_v33 }
 0x69d   :  { %v1114_v36 = vrot.slane %v1113_v35, 2 }
 0x69f   :  { %v1115_v37 = vadd.f32 %v1114_v36, %v1113_v35 }
 0x6a1   :  { %v1116_v38 = vrot.slane %v1115_v37, 1 }
 0x6a3   :  { %v1117_v3 = vadd.f32 %v1116_v38, %v1115_v37 }
 0x6a5   :  { %v1118_v39 = vmul.f32 0.5, %v1117_v3 }
 0x6a7   :  { %1120 = vst.msk [vmem:[#allocation7] sm:$0x1] %vm1119_vm3, %v1118_v39 }
 0x6a8   :  { %1131 = dma.vmem_to_hbm [thread:$0]  %s1127_s6, 16, %s1129_s9, [#allocation4]  }
 0x6a9   :  { %1375 = dma.done.wait [#allocation4], 16  }
 0x6aa   :  { %1376 = vsyncadd [#allocation4], 4294967280 }
 0x6ab   :  { %1136 = vsyncpa [#allocation3], 1 }
 0x6ac   :  { %1137 = vsyncpa [#allocation6], 1 }
 0x6ad   :  { %1138 = vsyncpa [#allocation4], 1 }

</bundles_post_ra>
